<compile_context>
chip_gen: v7x
topology: tpu7x:2x2x1
jax: 0.10.0
libtpu: 0.0.40
codegen_flags: <defaults>
</compile_context>

<pallas_src>
import jax
import jax.numpy as jnp
from jax.experimental import pallas as pl
from jax.experimental.pallas import tpu as pltpu


# --------------------------- fused forward kernel ---------------------------

def _discriminator_kernel(x_ref, w1_ref, b1_ref, w2_ref, b2_ref,
                          wf1_ref, bf1_ref, wf2_ref, bf2_ref, o_ref):
    """Whole Discriminator forward for one batch tile.

    x_ref  : (24*tb, 140) bf16  H-only im2col of the inputs; rows = (i, b),
                                lanes = ki*28 + w  (5 vertical taps folded in K)
    w1_ref : (140, 240)   bf16  conv1 banded weights, lanes = j*10 + co
    b1_ref : (1, 240)     f32
    w2_ref : (5, 230, 160) bf16 conv2 banded weights (pool1 lane-compaction absorbed)
    b2_ref : (1, 160)     f32
    wf1_ref: (4, 140, 50) bf16  fc1 weights split per pooled row u2
                                (pool2 lane-compaction + NCHW flatten absorbed)
    bf1_ref: (1, 50), wf2_ref: (1, 50), bf2_ref: (1, 1)   f32
    o_ref  : (tb, 1)      f32   sigmoid output
    """
    tb = o_ref.shape[0]

    # ---- conv1 (1->10, k=5): one MXU dot, K = 5*28 = 140 ----
    y1 = jnp.dot(x_ref[...], w1_ref[...],
                 preferred_element_type=jnp.float32)          # (24*tb, 240) f32
    y1 = y1 + b1_ref[...]

    # ---- maxpool 2x2 + relu: 24x24 -> 12x12 (all f32, VPU) ----
    y1w = y1.reshape(12, 2, tb, 240)
    hp1 = jnp.maximum(y1w[:, 0], y1w[:, 1])                   # H-pool (12, tb, 240)
    wp1 = jnp.maximum(hp1[:, :, 0:230], hp1[:, :, 10:240])    # W-pool (sparse lanes)
    p1 = jnp.maximum(wp1, 0.0)                                # (12, tb, 230) f32

    # ---- conv2 (10->20, k=5): 5 banded dots, K=230, bf16 operands, f32 acc ----
    a2 = p1[0:8].reshape(8 * tb, 230).astype(jnp.bfloat16)
    y2 = jnp.dot(a2, w2_ref[0], preferred_element_type=jnp.float32)
    for ki in range(1, 5):
        a2 = p1[ki:ki + 8].reshape(8 * tb, 230).astype(jnp.bfloat16)
        y2 = y2 + jnp.dot(a2, w2_ref[ki], preferred_element_type=jnp.float32)
    y2 = y2 + b2_ref[...]                                     # (8*tb, 160) f32
    # TODO(synk): Dropout2d is identity here (eval mode).

    # ---- maxpool 2x2 + relu: 8x8 -> 4x4 ----
    y2w = y2.reshape(4, 2, tb, 160)
    hp2 = jnp.maximum(y2w[:, 0], y2w[:, 1])                   # (4, tb, 160)
    wp2 = jnp.maximum(hp2[:, :, 0:140], hp2[:, :, 20:160])
    p2 = jnp.maximum(wp2, 0.0)                                # (4, tb, 140) f32

    # ---- fc1 (320->50) + relu: 4 banded dots (one per pooled row) ----
    h = jnp.dot(p2[0].astype(jnp.bfloat16), wf1_ref[0],
                preferred_element_type=jnp.float32)
    for u2 in range(1, 4):
        h = h + jnp.dot(p2[u2].astype(jnp.bfloat16), wf1_ref[u2],
                        preferred_element_type=jnp.float32)
    h = jnp.maximum(h + bf1_ref[...], 0.0)                    # (tb, 50) f32
    # TODO(synk): Dropout(p=0.2) is identity here (eval mode).

    # ---- fc2 (50->1) + sigmoid (exp + reciprocal both on the EUP slot) ----
    z = jnp.sum(h * wf2_ref[...], axis=1, keepdims=True) + bf2_ref[...]  # (tb, 1)
    o_ref[...] = pl.reciprocal(1.0 + jnp.exp(-z), approx=True)


# --------------------------- parameter preparation ---------------------------

def prepare_params(params):
    """One-time repack of PyTorch-layout weights into the kernel's layouts.

    Matmul weights are stored in bf16 (native MXU path); biases stay f32.
    """
    w1, b1, w2, b2, wf1, bf1, wf2, bf2 = params
    f32, bf16 = jnp.float32, jnp.bfloat16

    # conv1 banded: M1[ki*28 + w, j*10 + co] = w1[co, 0, ki, w - j] if 0 <= w-j <= 4
    ki = jnp.arange(5)[:, None, None, None]
    w_ = jnp.arange(28)[None, :, None, None]
    j_ = jnp.arange(24)[None, None, :, None]
    co = jnp.arange(10)[None, None, None, :]
    kj = w_ - j_
    valid = (kj >= 0) & (kj <= 4)
    w1g = w1[:, 0, :, :]                                      # (co, ki, kj)
    vals = w1g[co, ki, jnp.clip(kj, 0, 4)]                    # (5, 28, 24, 10)
    m1 = jnp.where(valid, vals, 0.0).reshape(140, 240).astype(bf16)
    b1t = jnp.tile(b1.reshape(1, 1, 10), (1, 24, 1)).reshape(1, 240).astype(f32)

    # conv2 banded: input lanes L = 20*v + c (c<=9 valid after pool1):
    # M2[ki][L, j2*20 + co2] = w2[co2, c, ki, v - j2] if c<=9 and 0 <= v-j2 <= 4
    L = jnp.arange(230)
    v_ = (L // 20)[None, :, None, None]
    c_ = (L % 20)[None, :, None, None]
    ki2 = jnp.arange(5)[:, None, None, None]
    j2 = jnp.arange(8)[None, None, :, None]
    co2 = jnp.arange(20)[None, None, None, :]
    kj2 = v_ - j2
    valid2 = (c_ <= 9) & (kj2 >= 0) & (kj2 <= 4)
    vals2 = w2[co2, jnp.clip(c_, 0, 9), ki2, jnp.clip(kj2, 0, 4)]  # (5,230,8,20)
    m2 = jnp.where(valid2, vals2, 0.0).reshape(5, 230, 160).astype(bf16)
    b2t = jnp.tile(b2.reshape(1, 1, 20), (1, 8, 1)).reshape(1, 160).astype(f32)

    # fc1: per pooled row u2, lanes l = 40*v2 + c2 (c2<=19 valid after pool2);
    # PyTorch flatten (NCHW) feature index f = c2*16 + u2*4 + v2
    l = jnp.arange(140)
    v2 = l // 40
    c2 = l % 40
    validf = c2 <= 19
    u2 = jnp.arange(4)[:, None]
    f_idx = jnp.clip(c2, 0, 19)[None, :] * 16 + u2 * 4 + v2[None, :]  # (4, 140)
    gathered = wf1.T[f_idx]                                   # (4, 140, 50)
    wf1s = jnp.where(validf[None, :, None], gathered, 0.0).astype(bf16)
    bf1r = bf1.reshape(1, 50).astype(f32)
    wf2r = wf2.reshape(1, 50).astype(f32)
    bf2r = bf2.reshape(1, 1).astype(f32)
    return (m1, b1t, m2, b2t, wf1s, bf1r, wf2r, bf2r)


# ------------------------------- forward wrapper -----------------------------

def _round_up(n, m):
    return ((n + m - 1) // m) * m


def discriminator_forward(x_nchw, prepped, tb_max=256):
    """x_nchw: (B, 1, 28, 28) float32 -> (B, 1) sigmoid scores."""
    m1, b1t, m2, b2t, wf1s, bf1r, wf2r, bf2r = prepped
    B = x_nchw.shape[0]
    # Batch tile: big (default 256) to amortize grid-step overhead and fill the
    # MXU M dimension; for very large B on v7x this automatically yields >=2
    # grid steps that the "parallel" axis can shard across the 2 TensorCores.
    tb = _round_up(min(tb_max, _round_up(max(B, 1), 8)), 8)
    Bp = _round_up(B, tb)
    ng = Bp // tb

    # ---- host-side H-only im2col (folds conv1's 5 vertical taps into K) ----
    x3 = x_nchw.reshape(B, 28, 28).astype(jnp.float32)
    if Bp != B:
        x3 = jnp.pad(x3, ((0, Bp - B), (0, 0), (0, 0)))
    # cols[b, i, ki, w] = x3[b, i + ki, w]
    cols = jnp.stack([x3[:, k:k + 24, :] for k in range(5)], axis=2)  # (Bp,24,5,28)
    # Group rows by batch tile, (i, b) major inside each tile, taps merged into
    # lanes -> kernel consumes this with no in-kernel reshape of bf16 data.
    xg = cols.reshape(ng, tb, 24, 140)
    xg = jnp.transpose(xg, (0, 2, 1, 3)).reshape(ng * 24 * tb, 140)
    xg = xg.astype(jnp.bfloat16)                               # matmul operand only

    out = pl.pallas_call(
        _discriminator_kernel,
        out_shape=jax.ShapeDtypeStruct((Bp, 1), jnp.float32),
        grid=(ng,),
        in_specs=[
            pl.BlockSpec((24 * tb, 140), lambda i: (i, 0)),
            pl.BlockSpec((140, 240), lambda i: (0, 0)),
            pl.BlockSpec((1, 240), lambda i: (0, 0)),
            pl.BlockSpec((5, 230, 160), lambda i: (0, 0, 0)),
            pl.BlockSpec((1, 160), lambda i: (0, 0)),
            pl.BlockSpec((4, 140, 50), lambda i: (0, 0, 0)),
            pl.BlockSpec((1, 50), lambda i: (0, 0)),
            pl.BlockSpec((1, 50), lambda i: (0, 0)),
            pl.BlockSpec((1, 1), lambda i: (0, 0)),
        ],
        out_specs=pl.BlockSpec((tb, 1), lambda i: (i, 0)),
        compiler_params=pltpu.CompilerParams(
            dimension_semantics=("parallel",),
            # above v5e's 16 MiB scoped default, below v7x's 64 MiB physical
            vmem_limit_bytes=48 * 1024 * 1024),
    )(xg, m1, b1t, m2, b2t, wf1s, bf1r, wf2r, bf2r)
    return out[:B]


# -------------------------------- reference ----------------------------------

def reference_forward(x_nchw, params):
    w1, b1, w2, b2, wf1, bf1, wf2, bf2 = params
    dn = ('NCHW', 'OIHW', 'NCHW')
    y = jax.lax.conv_general_dilated(x_nchw, w1, (1, 1), 'VALID',
                                     dimension_numbers=dn) + b1.reshape(1, -1, 1, 1)
    y = jax.lax.reduce_window(y, -jnp.inf, jax.lax.max, (1, 1, 2, 2),
                              (1, 1, 2, 2), 'VALID')
    y = jnp.maximum(y, 0.0)
    y = jax.lax.conv_general_dilated(y, w2, (1, 1), 'VALID',
                                     dimension_numbers=dn) + b2.reshape(1, -1, 1, 1)
    y = jax.lax.reduce_window(y, -jnp.inf, jax.lax.max, (1, 1, 2, 2),
                              (1, 1, 2, 2), 'VALID')
    y = jnp.maximum(y, 0.0)
    flat = y.reshape(y.shape[0], -1)                          # (B, 320) CHW order
    h = jnp.maximum(flat @ wf1.T + bf1, 0.0)
    z = h @ wf2.T + bf2
    return jax.nn.sigmoid(z)


# ----------------------------------- main ------------------------------------

def init_params(key):
    ks = jax.random.split(key, 8)
    w1 = jax.random.normal(ks[0], (10, 1, 5, 5), jnp.float32) * 0.1
    b1 = jax.random.normal(ks[1], (10,), jnp.float32) * 0.1
    w2 = jax.random.normal(ks[2], (20, 10, 5, 5), jnp.float32) * 0.05
    b2 = jax.random.normal(ks[3], (20,), jnp.float32) * 0.05
    wf1 = jax.random.normal(ks[4], (50, 320), jnp.float32) * 0.05
    bf1 = jax.random.normal(ks[5], (50,), jnp.float32) * 0.05
    wf2 = jax.random.normal(ks[6], (1, 50), jnp.float32) * 0.1
    bf2 = jax.random.normal(ks[7], (1,), jnp.float32) * 0.1
    return (w1, b1, w2, b2, wf1, bf1, wf2, bf2)


if __name__ == "__main__":
    key = jax.random.PRNGKey(0)
    pkey, xkey, xkey2 = jax.random.split(key, 3)
    params = init_params(pkey)
    prepped = prepare_params(params)          # one-time weight repack (hoisted)

    B = 2                                     # MNIST-style 28x28 implied by fc1(320)
    x = jax.random.normal(xkey, (B, 1, 28, 28), jnp.float32)

    fwd = jax.jit(discriminator_forward, static_argnames=("tb_max",))
    out = jax.block_until_ready(fwd(x, prepped))
    ref = jax.block_until_ready(reference_forward(x, params))

    assert out.shape == (B, 1), out.shape
    assert out.dtype == jnp.float32
    assert bool(jnp.all(jnp.isfinite(out)))
    assert bool(jnp.all((out >= 0.0) & (out <= 1.0)))
    # bf16 matmul operands with f32 accumulation: loosen tolerance slightly
    assert bool(jnp.allclose(out, ref, atol=2e-2, rtol=2e-2)), (out, ref)

    # Exercise the multi-step grid path (3 batch tiles) with a tiny tile.
    B2 = 20
    x2 = jax.random.normal(xkey2, (B2, 1, 28, 28), jnp.float32)
    out2 = jax.block_until_ready(fwd(x2, prepped, tb_max=8))
    ref2 = jax.block_until_ready(reference_forward(x2, params))
    assert out2.shape == (B2, 1)
    assert bool(jnp.allclose(out2, ref2, atol=2e-2, rtol=2e-2)), (out2, ref2)

    print("KERNEL_OK")
</pallas_src>

<mosaic_0001>
module attributes {stable_mosaic.version = 11 : i64} {
  func.func @_discriminator_kernel(%arg0: i32, %arg1: memref<192x140xbf16, #tpu.memory_space<vmem>>, %arg2: memref<140x240xbf16, #tpu.memory_space<vmem>>, %arg3: memref<1x240xf32, #tpu.memory_space<vmem>>, %arg4: memref<5x230x160xbf16, #tpu.memory_space<vmem>>, %arg5: memref<1x160xf32, #tpu.memory_space<vmem>>, %arg6: memref<4x140x50xbf16, #tpu.memory_space<vmem>>, %arg7: memref<1x50xf32, #tpu.memory_space<vmem>>, %arg8: memref<1x50xf32, #tpu.memory_space<vmem>>, %arg9: memref<1x1xf32, #tpu.memory_space<vmem>>, %arg10: memref<8x1xf32, #tpu.memory_space<vmem>>) attributes {dimension_semantics = [#tpu.dimension_semantics<parallel>], iteration_bounds = array<i64: 1>, scalar_prefetch = 0 : i64, scratch_operands = 0 : i64, tpu.core_type = #tpu.core_type<tc>, window_params = [{transform_indices = @transform_0, window_bounds = array<i64: 192, 140>}, {pipeline_mode = #tpu.pipeline_mode<synchronous>, transform_indices = @transform_1, window_bounds = array<i64: 140, 240>}, {pipeline_mode = #tpu.pipeline_mode<synchronous>, transform_indices = @transform_2, window_bounds = array<i64: 1, 240>}, {pipeline_mode = #tpu.pipeline_mode<synchronous>, transform_indices = @transform_3, window_bounds = array<i64: 5, 230, 160>}, {pipeline_mode = #tpu.pipeline_mode<synchronous>, transform_indices = @transform_4, window_bounds = array<i64: 1, 160>}, {pipeline_mode = #tpu.pipeline_mode<synchronous>, transform_indices = @transform_5, window_bounds = array<i64: 4, 140, 50>}, {pipeline_mode = #tpu.pipeline_mode<synchronous>, transform_indices = @transform_6, window_bounds = array<i64: 1, 50>}, {pipeline_mode = #tpu.pipeline_mode<synchronous>, transform_indices = @transform_7, window_bounds = array<i64: 1, 50>}, {pipeline_mode = #tpu.pipeline_mode<synchronous>, transform_indices = @transform_8, window_bounds = array<i64: 1, 1>}, {transform_indices = @transform_9, window_bounds = array<i64: 8, 1>}]} {
    %c0 = arith.constant 0 : index
    %c0_0 = arith.constant 0 : index
    %0 = vector.load %arg1[%c0, %c0_0] : memref<192x140xbf16, #tpu.memory_space<vmem>>, vector<192x140xbf16>
    %c0_1 = arith.constant 0 : index
    %c0_2 = arith.constant 0 : index
    %1 = vector.load %arg2[%c0_1, %c0_2] : memref<140x240xbf16, #tpu.memory_space<vmem>>, vector<140x240xbf16>
    %cst = arith.constant dense<0.000000e+00> : vector<192x240xf32>
    %2 = tpu.matmul %0, %1, %cst {dimension_numbers = #tpu.dot_dimension_numbers<[1], [0], [0], [1], [0, 0, 1, 1], [], []>} : vector<192x140xbf16>, vector<140x240xbf16>, vector<192x240xf32> -> vector<192x240xf32>
    %c0_3 = arith.constant 0 : index
    %c0_4 = arith.constant 0 : index
    %3 = vector.load %arg3[%c0_3, %c0_4] : memref<1x240xf32, #tpu.memory_space<vmem>>, vector<1x240xf32>
    %4 = vector.broadcast %3 : vector<1x240xf32> to vector<192x240xf32>
    %5 = arith.addf %2, %4 : vector<192x240xf32>
    %6 = vector.shape_cast %5 : vector<192x240xf32> to vector<12x2x8x240xf32>
    %7 = vector.extract_strided_slice %6 {offsets = [0, 0, 0, 0], sizes = [12, 1, 8, 240], strides = [1, 1, 1, 1]} : vector<12x2x8x240xf32> to vector<12x1x8x240xf32>
    %8 = vector.shape_cast %7 : vector<12x1x8x240xf32> to vector<12x8x240xf32>
    %9 = vector.extract_strided_slice %6 {offsets = [0, 1, 0, 0], sizes = [12, 1, 8, 240], strides = [1, 1, 1, 1]} : vector<12x2x8x240xf32> to vector<12x1x8x240xf32>
    %10 = vector.shape_cast %9 : vector<12x1x8x240xf32> to vector<12x8x240xf32>
    %11 = arith.maximumf %8, %10 : vector<12x8x240xf32>
    %12 = vector.extract_strided_slice %11 {offsets = [0, 0, 0], sizes = [12, 8, 230], strides = [1, 1, 1]} : vector<12x8x240xf32> to vector<12x8x230xf32>
    %13 = vector.extract_strided_slice %11 {offsets = [0, 0, 10], sizes = [12, 8, 230], strides = [1, 1, 1]} : vector<12x8x240xf32> to vector<12x8x230xf32>
    %14 = arith.maximumf %12, %13 : vector<12x8x230xf32>
    %cst_5 = arith.constant 0.000000e+00 : f32
    %15 = vector.broadcast %cst_5 : f32 to vector<12x8x230xf32>
    %16 = arith.maximumf %14, %15 : vector<12x8x230xf32>
    %17 = vector.extract_strided_slice %16 {offsets = [0, 0, 0], sizes = [8, 8, 230], strides = [1, 1, 1]} : vector<12x8x230xf32> to vector<8x8x230xf32>
    %18 = vector.shape_cast %17 : vector<8x8x230xf32> to vector<64x230xf32>
    %19 = arith.truncf %18 : vector<64x230xf32> to vector<64x230xbf16>
    %c0_6 = arith.constant 0 : index
    %c0_7 = arith.constant 0 : index
    %c0_8 = arith.constant 0 : index
    %20 = vector.load %arg4[%c0_6, %c0_7, %c0_8] : memref<5x230x160xbf16, #tpu.memory_space<vmem>>, vector<1x230x160xbf16>
    %21 = vector.shape_cast %20 : vector<1x230x160xbf16> to vector<230x160xbf16>
    %cst_9 = arith.constant dense<0.000000e+00> : vector<64x160xf32>
    %22 = tpu.matmul %19, %21, %cst_9 {dimension_numbers = #tpu.dot_dimension_numbers<[1], [0], [0], [1], [0, 0, 1, 1], [], []>} : vector<64x230xbf16>, vector<230x160xbf16>, vector<64x160xf32> -> vector<64x160xf32>
    %23 = vector.extract_strided_slice %16 {offsets = [1, 0, 0], sizes = [8, 8, 230], strides = [1, 1, 1]} : vector<12x8x230xf32> to vector<8x8x230xf32>
    %24 = vector.shape_cast %23 : vector<8x8x230xf32> to vector<64x230xf32>
    %25 = arith.truncf %24 : vector<64x230xf32> to vector<64x230xbf16>
    %c1 = arith.constant 1 : index
    %c0_10 = arith.constant 0 : index
    %c0_11 = arith.constant 0 : index
    %26 = vector.load %arg4[%c1, %c0_10, %c0_11] : memref<5x230x160xbf16, #tpu.memory_space<vmem>>, vector<1x230x160xbf16>
    %27 = vector.shape_cast %26 : vector<1x230x160xbf16> to vector<230x160xbf16>
    %cst_12 = arith.constant dense<0.000000e+00> : vector<64x160xf32>
    %28 = tpu.matmul %25, %27, %cst_12 {dimension_numbers = #tpu.dot_dimension_numbers<[1], [0], [0], [1], [0, 0, 1, 1], [], []>} : vector<64x230xbf16>, vector<230x160xbf16>, vector<64x160xf32> -> vector<64x160xf32>
    %29 = arith.addf %22, %28 : vector<64x160xf32>
    %30 = vector.extract_strided_slice %16 {offsets = [2, 0, 0], sizes = [8, 8, 230], strides = [1, 1, 1]} : vector<12x8x230xf32> to vector<8x8x230xf32>
    %31 = vector.shape_cast %30 : vector<8x8x230xf32> to vector<64x230xf32>
    %32 = arith.truncf %31 : vector<64x230xf32> to vector<64x230xbf16>
    %c2 = arith.constant 2 : index
    %c0_13 = arith.constant 0 : index
    %c0_14 = arith.constant 0 : index
    %33 = vector.load %arg4[%c2, %c0_13, %c0_14] : memref<5x230x160xbf16, #tpu.memory_space<vmem>>, vector<1x230x160xbf16>
    %34 = vector.shape_cast %33 : vector<1x230x160xbf16> to vector<230x160xbf16>
    %cst_15 = arith.constant dense<0.000000e+00> : vector<64x160xf32>
    %35 = tpu.matmul %32, %34, %cst_15 {dimension_numbers = #tpu.dot_dimension_numbers<[1], [0], [0], [1], [0, 0, 1, 1], [], []>} : vector<64x230xbf16>, vector<230x160xbf16>, vector<64x160xf32> -> vector<64x160xf32>
    %36 = arith.addf %29, %35 : vector<64x160xf32>
    %37 = vector.extract_strided_slice %16 {offsets = [3, 0, 0], sizes = [8, 8, 230], strides = [1, 1, 1]} : vector<12x8x230xf32> to vector<8x8x230xf32>
    %38 = vector.shape_cast %37 : vector<8x8x230xf32> to vector<64x230xf32>
    %39 = arith.truncf %38 : vector<64x230xf32> to vector<64x230xbf16>
    %c3 = arith.constant 3 : index
    %c0_16 = arith.constant 0 : index
    %c0_17 = arith.constant 0 : index
    %40 = vector.load %arg4[%c3, %c0_16, %c0_17] : memref<5x230x160xbf16, #tpu.memory_space<vmem>>, vector<1x230x160xbf16>
    %41 = vector.shape_cast %40 : vector<1x230x160xbf16> to vector<230x160xbf16>
    %cst_18 = arith.constant dense<0.000000e+00> : vector<64x160xf32>
    %42 = tpu.matmul %39, %41, %cst_18 {dimension_numbers = #tpu.dot_dimension_numbers<[1], [0], [0], [1], [0, 0, 1, 1], [], []>} : vector<64x230xbf16>, vector<230x160xbf16>, vector<64x160xf32> -> vector<64x160xf32>
    %43 = arith.addf %36, %42 : vector<64x160xf32>
    %44 = vector.extract_strided_slice %16 {offsets = [4, 0, 0], sizes = [8, 8, 230], strides = [1, 1, 1]} : vector<12x8x230xf32> to vector<8x8x230xf32>
    %45 = vector.shape_cast %44 : vector<8x8x230xf32> to vector<64x230xf32>
    %46 = arith.truncf %45 : vector<64x230xf32> to vector<64x230xbf16>
    %c4 = arith.constant 4 : index
    %c0_19 = arith.constant 0 : index
    %c0_20 = arith.constant 0 : index
    %47 = vector.load %arg4[%c4, %c0_19, %c0_20] : memref<5x230x160xbf16, #tpu.memory_space<vmem>>, vector<1x230x160xbf16>
    %48 = vector.shape_cast %47 : vector<1x230x160xbf16> to vector<230x160xbf16>
    %cst_21 = arith.constant dense<0.000000e+00> : vector<64x160xf32>
    %49 = tpu.matmul %46, %48, %cst_21 {dimension_numbers = #tpu.dot_dimension_numbers<[1], [0], [0], [1], [0, 0, 1, 1], [], []>} : vector<64x230xbf16>, vector<230x160xbf16>, vector<64x160xf32> -> vector<64x160xf32>
    %50 = arith.addf %43, %49 : vector<64x160xf32>
    %c0_22 = arith.constant 0 : index
    %c0_23 = arith.constant 0 : index
    %51 = vector.load %arg5[%c0_22, %c0_23] : memref<1x160xf32, #tpu.memory_space<vmem>>, vector<1x160xf32>
    %52 = vector.broadcast %51 : vector<1x160xf32> to vector<64x160xf32>
    %53 = arith.addf %50, %52 : vector<64x160xf32>
    %54 = vector.shape_cast %53 : vector<64x160xf32> to vector<4x2x8x160xf32>
    %55 = vector.extract_strided_slice %54 {offsets = [0, 0, 0, 0], sizes = [4, 1, 8, 160], strides = [1, 1, 1, 1]} : vector<4x2x8x160xf32> to vector<4x1x8x160xf32>
    %56 = vector.shape_cast %55 : vector<4x1x8x160xf32> to vector<4x8x160xf32>
    %57 = vector.extract_strided_slice %54 {offsets = [0, 1, 0, 0], sizes = [4, 1, 8, 160], strides = [1, 1, 1, 1]} : vector<4x2x8x160xf32> to vector<4x1x8x160xf32>
    %58 = vector.shape_cast %57 : vector<4x1x8x160xf32> to vector<4x8x160xf32>
    %59 = arith.maximumf %56, %58 : vector<4x8x160xf32>
    %60 = vector.extract_strided_slice %59 {offsets = [0, 0, 0], sizes = [4, 8, 140], strides = [1, 1, 1]} : vector<4x8x160xf32> to vector<4x8x140xf32>
    %61 = vector.extract_strided_slice %59 {offsets = [0, 0, 20], sizes = [4, 8, 140], strides = [1, 1, 1]} : vector<4x8x160xf32> to vector<4x8x140xf32>
    %62 = arith.maximumf %60, %61 : vector<4x8x140xf32>
    %cst_24 = arith.constant 0.000000e+00 : f32
    %63 = vector.broadcast %cst_24 : f32 to vector<4x8x140xf32>
    %64 = arith.maximumf %62, %63 : vector<4x8x140xf32>
    %65 = vector.extract_strided_slice %64 {offsets = [0, 0, 0], sizes = [1, 8, 140], strides = [1, 1, 1]} : vector<4x8x140xf32> to vector<1x8x140xf32>
    %66 = vector.shape_cast %65 : vector<1x8x140xf32> to vector<8x140xf32>
    %67 = arith.truncf %66 : vector<8x140xf32> to vector<8x140xbf16>
    %c0_25 = arith.constant 0 : index
    %c0_26 = arith.constant 0 : index
    %c0_27 = arith.constant 0 : index
    %68 = vector.load %arg6[%c0_25, %c0_26, %c0_27] : memref<4x140x50xbf16, #tpu.memory_space<vmem>>, vector<1x140x50xbf16>
    %69 = vector.shape_cast %68 : vector<1x140x50xbf16> to vector<140x50xbf16>
    %cst_28 = arith.constant dense<0.000000e+00> : vector<8x50xf32>
    %70 = tpu.matmul %67, %69, %cst_28 {dimension_numbers = #tpu.dot_dimension_numbers<[1], [0], [0], [1], [0, 0, 1, 1], [], []>} : vector<8x140xbf16>, vector<140x50xbf16>, vector<8x50xf32> -> vector<8x50xf32>
    %71 = vector.extract_strided_slice %64 {offsets = [1, 0, 0], sizes = [1, 8, 140], strides = [1, 1, 1]} : vector<4x8x140xf32> to vector<1x8x140xf32>
    %72 = vector.shape_cast %71 : vector<1x8x140xf32> to vector<8x140xf32>
    %73 = arith.truncf %72 : vector<8x140xf32> to vector<8x140xbf16>
    %c1_29 = arith.constant 1 : index
    %c0_30 = arith.constant 0 : index
    %c0_31 = arith.constant 0 : index
    %74 = vector.load %arg6[%c1_29, %c0_30, %c0_31] : memref<4x140x50xbf16, #tpu.memory_space<vmem>>, vector<1x140x50xbf16>
    %75 = vector.shape_cast %74 : vector<1x140x50xbf16> to vector<140x50xbf16>
    %cst_32 = arith.constant dense<0.000000e+00> : vector<8x50xf32>
    %76 = tpu.matmul %73, %75, %cst_32 {dimension_numbers = #tpu.dot_dimension_numbers<[1], [0], [0], [1], [0, 0, 1, 1], [], []>} : vector<8x140xbf16>, vector<140x50xbf16>, vector<8x50xf32> -> vector<8x50xf32>
    %77 = arith.addf %70, %76 : vector<8x50xf32>
    %78 = vector.extract_strided_slice %64 {offsets = [2, 0, 0], sizes = [1, 8, 140], strides = [1, 1, 1]} : vector<4x8x140xf32> to vector<1x8x140xf32>
    %79 = vector.shape_cast %78 : vector<1x8x140xf32> to vector<8x140xf32>
    %80 = arith.truncf %79 : vector<8x140xf32> to vector<8x140xbf16>
    %c2_33 = arith.constant 2 : index
    %c0_34 = arith.constant 0 : index
    %c0_35 = arith.constant 0 : index
    %81 = vector.load %arg6[%c2_33, %c0_34, %c0_35] : memref<4x140x50xbf16, #tpu.memory_space<vmem>>, vector<1x140x50xbf16>
    %82 = vector.shape_cast %81 : vector<1x140x50xbf16> to vector<140x50xbf16>
    %cst_36 = arith.constant dense<0.000000e+00> : vector<8x50xf32>
    %83 = tpu.matmul %80, %82, %cst_36 {dimension_numbers = #tpu.dot_dimension_numbers<[1], [0], [0], [1], [0, 0, 1, 1], [], []>} : vector<8x140xbf16>, vector<140x50xbf16>, vector<8x50xf32> -> vector<8x50xf32>
    %84 = arith.addf %77, %83 : vector<8x50xf32>
    %85 = vector.extract_strided_slice %64 {offsets = [3, 0, 0], sizes = [1, 8, 140], strides = [1, 1, 1]} : vector<4x8x140xf32> to vector<1x8x140xf32>
    %86 = vector.shape_cast %85 : vector<1x8x140xf32> to vector<8x140xf32>
    %87 = arith.truncf %86 : vector<8x140xf32> to vector<8x140xbf16>
    %c3_37 = arith.constant 3 : index
    %c0_38 = arith.constant 0 : index
    %c0_39 = arith.constant 0 : index
    %88 = vector.load %arg6[%c3_37, %c0_38, %c0_39] : memref<4x140x50xbf16, #tpu.memory_space<vmem>>, vector<1x140x50xbf16>
    %89 = vector.shape_cast %88 : vector<1x140x50xbf16> to vector<140x50xbf16>
    %cst_40 = arith.constant dense<0.000000e+00> : vector<8x50xf32>
    %90 = tpu.matmul %87, %89, %cst_40 {dimension_numbers = #tpu.dot_dimension_numbers<[1], [0], [0], [1], [0, 0, 1, 1], [], []>} : vector<8x140xbf16>, vector<140x50xbf16>, vector<8x50xf32> -> vector<8x50xf32>
    %91 = arith.addf %84, %90 : vector<8x50xf32>
    %c0_41 = arith.constant 0 : index
    %c0_42 = arith.constant 0 : index
    %92 = vector.load %arg7[%c0_41, %c0_42] : memref<1x50xf32, #tpu.memory_space<vmem>>, vector<1x50xf32>
    %93 = vector.broadcast %92 : vector<1x50xf32> to vector<8x50xf32>
    %94 = arith.addf %91, %93 : vector<8x50xf32>
    %cst_43 = arith.constant 0.000000e+00 : f32
    %95 = vector.broadcast %cst_43 : f32 to vector<8x50xf32>
    %96 = arith.maximumf %94, %95 : vector<8x50xf32>
    %c0_44 = arith.constant 0 : index
    %c0_45 = arith.constant 0 : index
    %97 = vector.load %arg8[%c0_44, %c0_45] : memref<1x50xf32, #tpu.memory_space<vmem>>, vector<1x50xf32>
    %98 = vector.broadcast %97 : vector<1x50xf32> to vector<8x50xf32>
    %99 = arith.mulf %96, %98 : vector<8x50xf32>
    %cst_46 = arith.constant dense<0.000000e+00> : vector<8xf32>
    %100 = vector.multi_reduction <add>, %99, %cst_46 [1] : vector<8x50xf32> to vector<8xf32>
    %101 = vector.shape_cast %100 : vector<8xf32> to vector<8x1xf32>
    %c0_47 = arith.constant 0 : index
    %c0_48 = arith.constant 0 : index
    %102 = vector.load %arg9[%c0_47, %c0_48] : memref<1x1xf32, #tpu.memory_space<vmem>>, vector<1x1xf32>
    %103 = vector.broadcast %102 : vector<1x1xf32> to vector<8x1xf32>
    %104 = arith.addf %101, %103 : vector<8x1xf32>
    %cst_49 = arith.constant 0.000000e+00 : f32
    %105 = vector.broadcast %cst_49 : f32 to vector<8x1xf32>
    %106 = arith.subf %105, %104 : vector<8x1xf32>
    %107 = math.exp %106 : vector<8x1xf32>
    %cst_50 = arith.constant 1.000000e+00 : f32
    %108 = vector.broadcast %cst_50 : f32 to vector<8x1xf32>
    %109 = arith.addf %108, %107 : vector<8x1xf32>
    %110 = tpu.reciprocal %109 {approx = true} : vector<8x1xf32> -> vector<8x1xf32>
    %c0_51 = arith.constant 0 : index
    %c0_52 = arith.constant 0 : index
    %111 = vector.load %arg10[%c0_51, %c0_52] : memref<8x1xf32, #tpu.memory_space<vmem>>, vector<8x1xf32>
    tpu.vector_store %arg10[%c0_51, %c0_52], %110 {strides = array<i32>} : memref<8x1xf32, #tpu.memory_space<vmem>>, vector<8x1xf32>,
    return
  }
  func.func @transform_0(%arg0: i32) -> (i32, i32) {
    %c0_i32 = arith.constant 0 : i32
    %c0_i32_0 = arith.constant 0 : i32
    return %arg0, %c0_i32 : i32, i32
  }
  func.func @transform_1(%arg0: i32) -> (i32, i32) {
    %c0_i32 = arith.constant 0 : i32
    %c0_i32_0 = arith.constant 0 : i32
    %c0_i32_1 = arith.constant 0 : i32
    return %c0_i32, %c0_i32_0 : i32, i32
  }
  func.func @transform_2(%arg0: i32) -> (i32, i32) {
    %c0_i32 = arith.constant 0 : i32
    %c0_i32_0 = arith.constant 0 : i32
    %c0_i32_1 = arith.constant 0 : i32
    return %c0_i32, %c0_i32_0 : i32, i32
  }
  func.func @transform_3(%arg0: i32) -> (i32, i32, i32) {
    %c0_i32 = arith.constant 0 : i32
    %c0_i32_0 = arith.constant 0 : i32
    %c0_i32_1 = arith.constant 0 : i32
    %c0_i32_2 = arith.constant 0 : i32
    return %c0_i32, %c0_i32_0, %c0_i32_1 : i32, i32, i32
  }
  func.func @transform_4(%arg0: i32) -> (i32, i32) {
    %c0_i32 = arith.constant 0 : i32
    %c0_i32_0 = arith.constant 0 : i32
    %c0_i32_1 = arith.constant 0 : i32
    return %c0_i32, %c0_i32_0 : i32, i32
  }
  func.func @transform_5(%arg0: i32) -> (i32, i32, i32) {
    %c0_i32 = arith.constant 0 : i32
    %c0_i32_0 = arith.constant 0 : i32
    %c0_i32_1 = arith.constant 0 : i32
    %c0_i32_2 = arith.constant 0 : i32
    return %c0_i32, %c0_i32_0, %c0_i32_1 : i32, i32, i32
  }
  func.func @transform_6(%arg0: i32) -> (i32, i32) {
    %c0_i32 = arith.constant 0 : i32
    %c0_i32_0 = arith.constant 0 : i32
    %c0_i32_1 = arith.constant 0 : i32
    return %c0_i32, %c0_i32_0 : i32, i32
  }
  func.func @transform_7(%arg0: i32) -> (i32, i32) {
    %c0_i32 = arith.constant 0 : i32
    %c0_i32_0 = arith.constant 0 : i32
    %c0_i32_1 = arith.constant 0 : i32
    return %c0_i32, %c0_i32_0 : i32, i32
  }
  func.func @transform_8(%arg0: i32) -> (i32, i32) {
    %c0_i32 = arith.constant 0 : i32
    %c0_i32_0 = arith.constant 0 : i32
    %c0_i32_1 = arith.constant 0 : i32
    return %c0_i32, %c0_i32_0 : i32, i32
  }
  func.func @transform_9(%arg0: i32) -> (i32, i32) {
    %c0_i32 = arith.constant 0 : i32
    %c0_i32_0 = arith.constant 0 : i32
    return %arg0, %c0_i32 : i32, i32
  }
}

</mosaic_0001>

<bundles_post_ra>
// kernel: discriminator_forward.1
= control target key start
LH: loop header
LB: loop body
LE: loop exit
PB: predicated region body
PF: predicated region fallthrough
CT: control target
= control target key end

     0   :  { %vm285_vm0 = vcmask 97280   ;;  %vm322_vm1 = vcmask 1045504   ;;  %vm896_vm2 = vcmask 1042432   ;;  %vm578_vm3 = vcmask 965632   ;;  %s3562_s30 = smov 108   ;;  %s4725_s1 = inlined_call_operand.vmem [shape: bf16[140,240], index: 1, kind: input, shape index: {}]   ;;  %s4726_s0 = inlined_call_operand.vmem [shape: bf16[192,140], index: 0, kind: input, shape index: {}]   ;;  %s4727_s3 = inlined_call_operand.vmem [shape: bf16[5,230,160], index: 3, kind: input, shape index: {}]   ;;  %s4728_s2 = inlined_call_operand.vmem [shape: f32[1,240], index: 2, kind: input, shape index: {}]   ;;  %s4729_s5 = inlined_call_operand.vmem [shape: bf16[4,140,50], index: 5, kind: input, shape index: {}]   ;;  %s4730_s4 = inlined_call_operand.vmem [shape: f32[1,160], index: 4, kind: input, shape index: {}]   ;;  %s4731_s8 = inlined_call_operand.<no memory space> [shape: f32[1,1], index: 8, kind: input, shape index: {}]   ;;  %s4732_s6 = inlined_call_operand.vmem [shape: f32[1,50], index: 6, kind: input, shape index: {}]   ;;  %s4733_s7 = inlined_call_operand.vmem [shape: f32[1,50], index: 7, kind: input, shape index: {}]   ;;  %s4734_s9 = inlined_call_operand.vmem [shape: f32[8,1], index: 9, kind: output, shape index: {}]  }
   0x1   :  { %v3237_v0 = vld [vmem:[%s4725_s1 + $0x4] ss:$8 sps:$4 sm:$0xff]   ;;  %v3239_v1 = vld [vmem:[%s4725_s1] ss:$8 sps:$4 sm:$0xff]   ;;  %v3240_v2 = vld [vmem:[%s4725_s1 + $0x14] ss:$8 sps:$4 sm:$0xff]  }
   0x2   :  { %329 = vmatprep.subr.bf16.mxu0 %v3237_v0  ;;  %v3242_v3 = vld [vmem:[%s4725_s1 + $0x10] ss:$8 sps:$4 sm:$0xff]   ;;  %v3243_v4 = vld [vmem:[%s4725_s1 + $0x24] ss:$8 sps:$4 sm:$0xff]   ;;  %v3245_v5 = vld [vmem:[%s4725_s1 + $0x20] ss:$8 sps:$4 sm:$0xff]  }
   0x3   :  { %330 = vmatpush1.bf16.msra.mxu0 %v3239_v1  ;;  %v3246_v6 = vld [vmem:[%s4725_s1 + $0x34] ss:$8 sps:$4 sm:$0xff]   ;;  %v3248_v7 = vld [vmem:[%s4725_s1 + $0x30] ss:$8 sps:$4 sm:$0xff]   ;;  %v3249_v8 = vld [vmem:[%s4725_s1 + $0x44] ss:$8 sps:$4 sm:$0xff]  }
   0x4   :  { %331 = vmatprep.subr.bf16.mxu0 %v3240_v2  ;;  %v3266_v9 = vld [vmem:[%s4726_s0 + $0x4] ss:$8 sps:$4 sm:$0xff]   ;;  %v3251_v10 = vld [vmem:[%s4725_s1 + $0x40] ss:$8 sps:$4 sm:$0xff]   ;;  %v3252_v11 = vld [vmem:[%s4725_s1 + $0x54] ss:$8 sps:$4 sm:$0xff]  }
   0x5   :  { %2690 = vmatprep.mubr.msk.bf16.mxu0 %vm285_vm0, %v3266_v9  ;;  %v3254_v12 = vld [vmem:[%s4725_s1 + $0x50] ss:$8 sps:$4 sm:$0xff]   ;;  %v3255_v13 = vld [vmem:[%s4725_s1 + $0x64] ss:$8 sps:$4 sm:$0xff]   ;;  %v3257_v14 = vld [vmem:[%s4725_s1 + $0x60] ss:$8 sps:$4 sm:$0xff]  }
   0x6   :  { %v3258_v15 = vld [vmem:[%s4725_s1 + $0x74] ss:$8 sps:$4 sm:$0xff]   ;;  %v3260_v16 = vld [vmem:[%s4725_s1 + $0x70] ss:$8 sps:$4 sm:$0xff]   ;;  %v3264_v20 = vld [vmem:[%s4726_s0] ss:$8 sps:$4 sm:$0xff]  }
   0x7   :  { %332 = vmatpush1.bf16.msra.mxu0 %v3242_v3  ;;  %v3261_v17 = vld [vmem:[%s4725_s1 + $0x84] ss:$8 sps:$4 sm:$0x3f]   ;;  %v3263_v18 = vld [vmem:[%s4725_s1 + $0x80] ss:$8 sps:$4 sm:$0x3f]  }
   0x8   :  { %333 = vmatprep.subr.bf16.mxu0 %v3243_v4  ;;  %v324_v19 = vsel %vm322_vm1, %v3263_v18, 0  ;;  %v3267_v21 = vld [vmem:[%s4726_s0 + $0x14] ss:$8 sps:$4 sm:$0xff]   ;;  %v3269_v22 = vld [vmem:[%s4726_s0 + $0x10] ss:$8 sps:$4 sm:$0xff]   ;;  %vm883_vm4 = vcmask 834560  }
   0x9   :  { %v3270_v23 = vld [vmem:[%s4726_s0 + $0x24] ss:$8 sps:$4 sm:$0xff]   ;;  %v3272_v24 = vld [vmem:[%s4726_s0 + $0x20] ss:$8 sps:$4 sm:$0xff]   ;;  %v3273_v25 = vld [vmem:[%s4726_s0 + $0x34] ss:$8 sps:$4 sm:$0xff]  }
   0xa   :  { %v3275_v26 = vld [vmem:[%s4726_s0 + $0x30] ss:$8 sps:$4 sm:$0xff]   ;;  %v3276_v27 = vld [vmem:[%s4726_s0 + $0x44] ss:$8 sps:$4 sm:$0xff]   ;;  %v3278_v28 = vld [vmem:[%s4726_s0 + $0x40] ss:$8 sps:$4 sm:$0xff]  }
   0xb   :  { %334 = vmatpush1.bf16.msra.mxu0 %v3245_v5  ;;  %v3279_v29 = vld [vmem:[%s4726_s0 + $0x54] ss:$8 sps:$4 sm:$0xff]   ;;  %v3281_v30 = vld [vmem:[%s4726_s0 + $0x50] ss:$8 sps:$4 sm:$0xff]   ;;  %v3282_v31 = vld [vmem:[%s4726_s0 + $0x64] ss:$8 sps:$4 sm:$0xff]  }
   0xc   :  { %335 = vmatprep.subr.bf16.mxu0 %v3246_v6  ;;  %v3284_v32 = vld [vmem:[%s4726_s0 + $0x60] ss:$8 sps:$4 sm:$0xff]   ;;  %v3285_v33 = vld [vmem:[%s4726_s0 + $0x74] ss:$8 sps:$4 sm:$0xff]   ;;  %v3287_v34 = vld [vmem:[%s4726_s0 + $0x70] ss:$8 sps:$4 sm:$0xff]  }
   0xd   :  { %v3288_v35 = vld [vmem:[%s4726_s0 + $0x84] ss:$8 sps:$4 sm:$0xff]   ;;  %v3290_v36 = vld [vmem:[%s4726_s0 + $0x80] ss:$8 sps:$4 sm:$0xff]   ;;  %v3291_v37 = vld [vmem:[%s4726_s0 + $0x94] ss:$8 sps:$4 sm:$0xff]  }
   0xe   :  { %v3293_v38 = vld [vmem:[%s4726_s0 + $0x90] ss:$8 sps:$4 sm:$0xff]   ;;  %v3294_v39 = vld [vmem:[%s4726_s0 + $0xa4] ss:$8 sps:$4 sm:$0xff]   ;;  %v3296_v40 = vld [vmem:[%s4726_s0 + $0xa0] ss:$8 sps:$4 sm:$0xff]  }
   0xf   :  { %336 = vmatpush1.bf16.msra.mxu0 %v3248_v7  ;;  %v3297_v41 = vld [vmem:[%s4726_s0 + $0xb4] ss:$8 sps:$4 sm:$0xff]   ;;  %v3299_v42 = vld [vmem:[%s4726_s0 + $0xb0] ss:$8 sps:$4 sm:$0xff]   ;;  %v3300_v43 = vld [vmem:[%s4727_s3 + $0x4] ss:$8 sps:$4 sm:$0xff]  }
  0x10   :  { %337 = vmatprep.subr.bf16.mxu0 %v3249_v8  ;;  %v3302_v44 = vld [vmem:[%s4727_s3] ss:$8 sps:$4 sm:$0xff]   ;;  %1139 = vmatprep.subr.bf16.mxu1 %v3300_v43  ;;  %v3303_v45 = vld [vmem:[%s4727_s3 + $0x14] ss:$8 sps:$4 sm:$0xff]   ;;  %v3305_v46 = vld [vmem:[%s4727_s3 + $0x10] ss:$8 sps:$4 sm:$0xff]  }
  0x11   :  { %1140 = vmatpush1.bf16.msra.mxu1 %v3302_v44  ;;  %v3306_v47 = vld [vmem:[%s4727_s3 + $0x24] ss:$8 sps:$4 sm:$0xff]   ;;  %v3311_v49 = vld [vmem:[%s4727_s3 + $0x20] ss:$8 sps:$4 sm:$0xff]   ;;  %v3312_v51 = vld [vmem:[%s4727_s3 + $0x34] ss:$8 sps:$4 sm:$0xff]  }
  0x12   :  { %1141 = vmatprep.subr.bf16.mxu1 %v3303_v45  ;;  %v3310_v48 = vld [vmem:[%s4727_s3 + $0xec] ss:$8 sps:$4 sm:$0xff]   ;;  %v3308_v50 = vld [vmem:[%s4727_s3 + $0xe8] ss:$8 sps:$4 sm:$0xff]   ;;  %v3316_v52 = vld [vmem:[%s4727_s3 + $0xfc] ss:$8 sps:$4 sm:$0xff]  }
  0x13   :  { %338 = vmatpush1.bf16.msra.mxu0 %v3251_v10  ;;  %v3317_v53 = vld [vmem:[%s4727_s3 + $0x30] ss:$8 sps:$4 sm:$0xff]   ;;  %v3318_v55 = vld [vmem:[%s4727_s3 + $0x44] ss:$8 sps:$4 sm:$0xff]   ;;  %v3323_v58 = vld [vmem:[%s4727_s3 + $0x40] ss:$8 sps:$4 sm:$0xff]  }
  0x14   :  { %339 = vmatprep.subr.bf16.mxu0 %v3252_v11  ;;  %v3314_v54 = vld [vmem:[%s4727_s3 + $0xf8] ss:$8 sps:$4 sm:$0xff]   ;;  %v3320_v56 = vld [vmem:[%s4727_s3 + $0x108] ss:$8 sps:$4 sm:$0xff]   ;;  %v3322_v57 = vld [vmem:[%s4727_s3 + $0x10c] ss:$8 sps:$4 sm:$0xff]  }
  0x15   :  { %1142 = vmatpush1.bf16.msra.mxu1 %v3305_v46  ;;  %v3324_v59 = vld [vmem:[%s4727_s3 + $0x54] ss:$8 sps:$4 sm:$0xff]   ;;  %v3326_v61 = vld [vmem:[%s4727_s3 + $0x118] ss:$8 sps:$4 sm:$0xff]   ;;  %v3330_v63 = vld [vmem:[%s4727_s3 + $0x64] ss:$8 sps:$4 sm:$0xff]  }
  0x16   :  { %1143 = vmatprep.subr.bf16.mxu1 %v3306_v47  ;;  %v3328_v60 = vld [vmem:[%s4727_s3 + $0x11c] ss:$8 sps:$4 sm:$0xff]   ;;  %v3329_v62 = vld [vmem:[%s4727_s3 + $0x50] ss:$8 sps:$4 sm:$0xff]   ;;  %v3334_v0 = vld [vmem:[%s4727_s3 + $0x12c] ss:$8 sps:$4 sm:$0xff]  }
  0x17   :  { %340 = vmatpush1.bf16.msra.mxu0 %v3254_v12  ;;  %v3335_v1 = vld [vmem:[%s4727_s3 + $0x60] ss:$8 sps:$4 sm:$0xff]   ;;  %v3336_v3 = vld [vmem:[%s4727_s3 + $0x74] ss:$8 sps:$4 sm:$0xff]   ;;  %v3341_v6 = vld [vmem:[%s4727_s3 + $0x70] ss:$8 sps:$4 sm:$0xff]  }
  0x18   :  { %341 = vmatprep.subr.bf16.mxu0 %v3255_v13  ;;  %v3332_v2 = vld [vmem:[%s4727_s3 + $0x128] ss:$8 sps:$4 sm:$0xff]   ;;  %v3340_v4 = vld [vmem:[%s4727_s3 + $0x13c] ss:$8 sps:$4 sm:$0xff]   ;;  %v3338_v5 = vld [vmem:[%s4727_s3 + $0x138] ss:$8 sps:$4 sm:$0xff]  }
  0x19   :  { %1144 = vmatpush1.bf16.msra.mxu1 %v3311_v49  ;;  %v3342_v7 = vld [vmem:[%s4727_s3 + $0x84] ss:$8 sps:$4 sm:$0xff]   ;;  %v3347_v9 = vld [vmem:[%s4727_s3 + $0x80] ss:$8 sps:$4 sm:$0xff]   ;;  %v3348_v11 = vld [vmem:[%s4727_s3 + $0x94] ss:$8 sps:$4 sm:$0xff]  }
  0x1a   :  { %1145 = vmatprep.subr.bf16.mxu1 %v3312_v51  ;;  %v3346_v8 = vld [vmem:[%s4727_s3 + $0x14c] ss:$8 sps:$4 sm:$0xff]   ;;  %v3344_v10 = vld [vmem:[%s4727_s3 + $0x148] ss:$8 sps:$4 sm:$0xff]   ;;  %v3352_v12 = vld [vmem:[%s4727_s3 + $0x15c] ss:$8 sps:$4 sm:$0xff]  }
  0x1b   :  { %342 = vmatpush1.bf16.msra.mxu0 %v3257_v14  ;;  %v3353_v13 = vld [vmem:[%s4727_s3 + $0x90] ss:$8 sps:$4 sm:$0xff]   ;;  %v3359_v18 = vld [vmem:[%s4727_s3 + $0xa0] ss:$8 sps:$4 sm:$0xff]   ;;  %v3376_v43 = vld [vmem:[%s4727_s3 + $0x19c] ss:$8 sps:$4 sm:$0xff]  }
  0x1c   :  { %343 = vmatprep.subr.bf16.mxu0 %v3258_v15  ;;  %v3350_v14 = vld [vmem:[%s4727_s3 + $0x158] ss:$8 sps:$4 sm:$0xff]   ;;  %v3354_v15 = vld [vmem:[%s4727_s3 + $0xa4] ss:$8 sps:$4 sm:$0xff]   ;;  %vm2097_vm5 = vcmask 883712   ;;  %vm2624_vm6 = vcmask 408576  }
  0x1d   :  { %1146 = vmatpush1.bf16.msra.mxu1 %v3317_v53  ;;  %v3377_v44 = vld [vmem:[%s4727_s3 + $0xd0] ss:$8 sps:$4 sm:$0xff]   ;;  %v3381_v51 = vld [vmem:[%s4727_s3 + $0x1ac] ss:$8 sps:$4 sm:$0xff]   ;;  %vm2641_vm7 = vcmask 7168  }
  0x1e   :  { %1147 = vmatprep.subr.bf16.mxu1 %v3318_v55  ;;  %v3374_v46 = vld [vmem:[%s4727_s3 + $0x198] ss:$8 sps:$4 sm:$0xff]  }
  0x1f   :  { %344 = vmatpush1.bf16.msra.mxu0 %v3260_v16  ;;  %v3358_v16 = vld [vmem:[%s4727_s3 + $0x16c] ss:$8 sps:$4 sm:$0xff]  }
  0x20   :  { %2689 = vmatprep.subr.msk.bf16.mxu0 %vm322_vm1, %v3261_v17  ;;  %v79_v17 = vlaneseq }
  0x21   :  { %1148 = vmatpush1.bf16.msra.mxu1 %v3323_v58 }
  0x22   :  { %1149 = vmatprep.subr.bf16.mxu1 %v3324_v59 }
  0x23   :  { %346 = vmatpush1.bf16.msra.mxu0 %v324_v19  ;;  %v3356_v19 = vld [vmem:[%s4727_s3 + $0x168] ss:$8 sps:$4 sm:$0xff]  }
  0x24   :  { %903 = vmatprep.subr.bf16.mxu0 %v3310_v48  ;;  %v699_v48 = vld [vmem:[%s4727_s3 + $0xe0] sm:$0x77] }
  0x25   :  { %1150 = vmatpush1.bf16.msra.mxu1 %v3329_v62  ;;  %v2795_v49 = vcombine.high %v699_v48, %v699_v48 }
  0x26   :  { %362 = vmatmul.mubr.bf16.vlgmr.msra.gmra.mrb[0].mxu0 %v3264_v20  ;;  %1151 = vmatprep.subr.bf16.mxu1 %v3330_v63  ;;  %v3873_v20 = vshrl.u32 %v79_v17, 7 }
  0x27   :  { %2691 = vmatprep.mubr.msk.bf16.mxu0 %vm285_vm0, %v3267_v21  ;;  %904 = vmatpush1.bf16.msra.mxu0 %v3308_v50  ;;  %v77_v21 = vld [vmem:[%s4728_s2] sm:$0x3]  ;;  %v3379_v50 = vld [vmem:[%s4727_s3 + $0x1a8] ss:$8 sps:$4 sm:$0xff]   ;;  %s3560_s2 = smov 118  }
  0x28   :  { %905 = vmatprep.subr.bf16.mxu0 %v3316_v52  ;;  %v2794_v52 = vcombine.low %v699_v48, %v699_v48 }
  0x29   :  { %1152 = vmatpush1.bf16.msra.mxu1 %v3335_v1 }
  0x2a   :  { %1153 = vmatprep.subr.bf16.mxu1 %v3336_v3 }
  0x2b   :  { %906 = vmatpush1.bf16.msra.mxu0 %v3314_v54 }
  0x2c   :  { %907 = vmatprep.subr.bf16.mxu0 %v3322_v57 }
  0x2d   :  { %1154 = vmatpush1.bf16.msra.mxu1 %v3341_v6  ;;  %v2730_v6 = vld [vmem:[%s4727_s3 + $0x1c8] sm:$0x77] }
  0x2e   :  { %372 = vmatmul.mubr.bf16.gmra.mrb[4].mxu0 %v3269_v22  ;;  %1155 = vmatprep.subr.bf16.mxu1 %v3342_v7  ;;  %v81_v22 = vsub.s32 0, %v3873_v20 }
  0x2f   :  { %2692 = vmatprep.mubr.msk.bf16.mxu0 %vm285_vm0, %v3270_v23  ;;  %908 = vmatpush1.bf16.msra.mxu0 %v3320_v56  ;;  %v3360_v23 = vld [vmem:[%s4727_s3 + $0xb4] ss:$8 sps:$4 sm:$0xff]   ;;  %v1134_v56 = vsel %vm896_vm2, %v2794_v52, 0 }
  0x30   :  { %909 = vmatprep.subr.bf16.mxu0 %v3328_v60 }
  0x31   :  { %1156 = vmatpush1.bf16.msra.mxu1 %v3347_v9  ;;  %v2760_v9 = vcombine.high %v2730_v6, %v2730_v6 }
  0x32   :  { %1157 = vmatprep.subr.bf16.mxu1 %v3348_v11 }
  0x33   :  { %910 = vmatpush1.bf16.msra.mxu0 %v3326_v61  ;;  %v3385_v61 = vld [vmem:[%s4727_s3 + $0x1d4] ss:$8 sps:$4 sm:$0xff]  }
  0x34   :  { %911 = vmatprep.subr.bf16.mxu0 %v3334_v0  ;;  %v3388_v0 = vld [vmem:[%s4727_s3 + $0x1bc] ss:$8 sps:$4 sm:$0xff]  }
  0x35   :  { %1158 = vmatpush1.bf16.msra.mxu1 %v3353_v13 }
  0x36   :  { %382 = vmatmul.mubr.bf16.gmra.mrb[8].mxu0 %v3272_v24  ;;  %1159 = vmatprep.subr.bf16.mxu1 %v3354_v15  ;;  %v85_v24 = vsub.s32 1, %v3873_v20 }
  0x37   :  { %2693 = vmatprep.mubr.msk.bf16.mxu0 %vm285_vm0, %v3273_v25  ;;  %912 = vmatpush1.bf16.msra.mxu0 %v3332_v2  ;;  %v3364_v25 = vld [vmem:[%s4727_s3 + $0x17c] ss:$8 sps:$4 sm:$0xff]   ;;  %v3386_v2 = vld [vmem:[%s4727_s3 + $0x1b8] ss:$8 sps:$4 sm:$0xff]  }
  0x38   :  { %913 = vmatprep.subr.bf16.mxu0 %v3340_v4 }
  0x39   :  { %1160 = vmatpush1.bf16.msra.mxu1 %v3359_v18 }
  0x3a   :  { %1161 = vmatprep.subr.bf16.mxu1 %v3360_v23 }
  0x3b   :  { %914 = vmatpush1.bf16.msra.mxu0 %v3338_v5 }
  0x3c   :  { %915 = vmatprep.subr.bf16.mxu0 %v3346_v8 }
  0x3e   :  { %392 = vmatmul.mubr.bf16.gmra.mrb[12].mxu0 %v3275_v26  ;;  %v3365_v26 = vld [vmem:[%s4727_s3 + $0xb0] ss:$8 sps:$4 sm:$0xff]  }
  0x3f   :  { %2694 = vmatprep.mubr.msk.bf16.mxu0 %vm285_vm0, %v3276_v27  ;;  %916 = vmatpush1.bf16.msra.mxu0 %v3344_v10  ;;  %v3362_v27 = vld [vmem:[%s4727_s3 + $0x178] ss:$8 sps:$4 sm:$0xff]   ;;  %v2759_v10 = vcombine.low %v2730_v6, %v2730_v6 }
  0x40   :  { %917 = vmatprep.subr.bf16.mxu0 %v3352_v12  ;;  %1162 = vmatpush1.bf16.msra.mxu1 %v3365_v26 }
  0x41   :  { %v898_v15 = vsel %vm896_vm2, %v2759_v10, 0 }
  0x43   :  { %918 = vmatpush1.bf16.msra.mxu0 %v3350_v14 }
  0x44   :  { %919 = vmatprep.subr.bf16.mxu0 %v3358_v16 }
  0x46   :  { %402 = vmatmul.mubr.bf16.gmra.mrb[16].mxu0 %v3278_v28  ;;  %v3894_v28 = vrot.slane %v77_v21, %v81_v22 }
  0x47   :  { %2695 = vmatprep.mubr.msk.bf16.mxu0 %vm285_vm0, %v3279_v29  ;;  %920 = vmatpush1.bf16.msra.mxu0 %v3356_v19  ;;  %v3366_v29 = vld [vmem:[%s4727_s3 + $0xc4] ss:$8 sps:$4 sm:$0xff]  }
  0x48   :  { %921 = vmatprep.subr.bf16.mxu0 %v3364_v25  ;;  %1163 = vmatprep.subr.bf16.mxu1 %v3366_v29 }
  0x4b   :  { %922 = vmatpush1.bf16.msra.mxu0 %v3362_v27 }
  0x4e   :  { %412 = vmatmul.mubr.bf16.gmra.mrb[20].mxu0 %v3281_v30  ;;  %v3368_v30 = vld [vmem:[%s4727_s3 + $0x188] ss:$8 sps:$4 sm:$0xff]  }
  0x4f   :  { %2696 = vmatprep.mubr.msk.bf16.mxu0 %vm285_vm0, %v3282_v31  ;;  %v3370_v31 = vld [vmem:[%s4727_s3 + $0x18c] ss:$8 sps:$4 sm:$0xff]  }
  0x50   :  { %923 = vmatprep.subr.bf16.mxu0 %v3370_v31 }
  0x51   :  { %924 = vmatpush1.bf16.msra.mxu0 %v3368_v30 }
  0x52   :  { %925 = vmatprep.subr.bf16.mxu0 %v3376_v43 }
  0x55   :  { %926 = vmatpush1.bf16.msra.mxu0 %v3374_v46 }
  0x56   :  { %422 = vmatmul.mubr.bf16.gmra.mrb[24].mxu0 %v3284_v32  ;;  %927 = vmatprep.subr.bf16.mxu0 %v3381_v51 }
  0x57   :  { %2697 = vmatprep.mubr.msk.bf16.mxu0 %vm285_vm0, %v3285_v33  ;;  %v3907_v33 = vrot.slane %v77_v21, %v85_v24 }
  0x59   :  { %928 = vmatpush1.bf16.msra.mxu0 %v3379_v50 }
  0x5a   :  { %929 = vmatprep.subr.bf16.mxu0 %v3388_v0 }
  0x5d   :  { %930 = vmatpush1.bf16.msra.mxu0 %v3386_v2 }
  0x5e   :  { %432 = vmatmul.mubr.bf16.gmra.mrb[28].mxu0 %v3287_v34  ;;  %v3371_v34 = vld [vmem:[%s4727_s3 + $0xc0] ss:$8 sps:$4 sm:$0xff]   ;;  %2761 = vmatprep.subr.msk.bf16.mxu0 %vm896_vm2, %v2760_v9 }
  0x5f   :  { %2698 = vmatprep.mubr.msk.bf16.mxu0 %vm285_vm0, %v3288_v35  ;;  %1164 = vmatpush1.bf16.msra.mxu1 %v3371_v34 }
  0x61   :  { %932 = vmatpush1.bf16.msra.mxu0 %v898_v15 }
  0x66   :  { %442 = vmatmul.mubr.bf16.gmra.mrb[32].mxu0 %v3290_v36 }
  0x67   :  { %2699 = vmatprep.mubr.msk.bf16.mxu0 %vm285_vm0, %v3291_v37 }
  0x6e   :  { %452 = vmatmul.mubr.bf16.gmra.mrb[36].mxu0 %v3293_v38 }
  0x6f   :  { %2700 = vmatprep.mubr.msk.bf16.mxu0 %vm285_vm0, %v3294_v39 }
  0x76   :  { %462 = vmatmul.mubr.bf16.gmra.mrb[40].mxu0 %v3296_v40  ;;  %v3372_v40 = vld [vmem:[%s4727_s3 + $0xd4] ss:$8 sps:$4 sm:$0xff]  }
  0x77   :  { %2701 = vmatprep.mubr.msk.bf16.mxu0 %vm285_vm0, %v3297_v41  ;;  %1165 = vmatprep.subr.bf16.mxu1 %v3372_v40 }
  0x78   :  { %1166 = vmatpush1.bf16.msra.mxu1 %v3377_v44 }
  0x79   :  { %2796 = vmatprep.subr.msk.bf16.mxu1 %vm896_vm2, %v2795_v49 }
  0x7c   :  { %1168 = vmatpush1.bf16.msra.mxu1 %v1134_v56 }
  0x7d   :  { %1398 = vmatprep.subr.bf16.mxu1 %v3385_v61 }
  0x7e   :  { %472 = vmatmul.mubr.bf16.gmra.mrb[44].mxu0 %v3299_v42 }
  0xf9   :  { %v363_v32 = vpop.f32.mrb[0].mxu0 }
  0xfa   :  { %v365_v35 = vpop.f32.mrb[1].mxu0  ;;  %v364_v37 = vadd.f32 %v363_v32, %v3894_v28 }
  0xfb   :  { %v367_v36 = vpop.f32.mrb[2].mxu0  ;;  %v366_v41 = vadd.f32 %v365_v35, %v3907_v33 }
  0xfc   :  { %v368_v38 = vadd.f32 %v367_v36, %v3894_v28  ;;  %v369_v39 = vpop.f32.mrb[3].mxu0 }
  0xfd   :  { %v370_v42 = vadd.f32 %v369_v39, %v3907_v33 }
  0xfe   :  { %v3925_v45 = vmax.f32 %v364_v37, %v368_v38 }
  0xff   :  { %v3930_v47 = vmax.f32 %v366_v41, %v370_v42 }
 0x101   :  { %v373_v53 = vpop.f32.mrb[4].mxu0  ;;  %v3157_v54 = vpack.i.bf16 %v3930_v47, %v3925_v45 }
 0x102   :  { %v375_v55 = vpop.f32.mrb[5].mxu0  ;;  %v374_v58 = vadd.f32 %v373_v53, %v3894_v28 }
 0x103   :  { %v377_v57 = vpop.f32.mrb[6].mxu0  ;;  %3158 = vrot.lane.b32.xlu0 %v3157_v54, %s3560_s2  ;;  %v376_v62 = vadd.f32 %v375_v55, %v3907_v33 }
 0x104   :  { %v378_v59 = vadd.f32 %v377_v57, %v3894_v28  ;;  %v379_v60 = vpop.f32.mrb[7].mxu0 }
 0x105   :  { %v380_v63 = vadd.f32 %v379_v60, %v3907_v33 }
 0x106   :  { %v3956_v1 = vmax.f32 %v374_v58, %v378_v59 }
 0x107   :  { %v3961_v3 = vmax.f32 %v376_v62, %v380_v63 }
 0x109   :  { %v383_v4 = vpop.f32.mrb[8].mxu0  ;;  %v3162_v5 = vpack.i.bf16 %v3961_v3, %v3956_v1 }
 0x10a   :  { %v384_v7 = vadd.f32 %v383_v4, %v3894_v28  ;;  %v385_v8 = vpop.f32.mrb[9].mxu0 }
 0x10b   :  { %v386_v11 = vadd.f32 %v385_v8, %v3907_v33  ;;  %v387_v12 = vpop.f32.mrb[10].mxu0  ;;  %3163 = vrot.lane.b32.xlu0 %v3162_v5, %s3560_s2 }
 0x10c   :  { %v388_v13 = vadd.f32 %v387_v12, %v3894_v28  ;;  %v389_v14 = vpop.f32.mrb[11].mxu0 }
 0x10d   :  { %v390_v16 = vadd.f32 %v389_v14, %v3907_v33 }
 0x10e   :  { %v3975_v17 = vmax.f32 %v384_v7, %v388_v13 }
 0x10f   :  { %v3977_v18 = vmax.f32 %v386_v11, %v390_v16 }
 0x111   :  { %v393_v19 = vpop.f32.mrb[12].mxu0  ;;  %v3167_v21 = vpack.i.bf16 %v3977_v18, %v3975_v17 }
 0x112   :  { %v394_v23 = vadd.f32 %v393_v19, %v3894_v28  ;;  %v395_v25 = vpop.f32.mrb[13].mxu0 }
 0x113   :  { %v396_v26 = vadd.f32 %v395_v25, %v3907_v33  ;;  %v397_v27 = vpop.f32.mrb[14].mxu0  ;;  %3168 = vrot.lane.b32.xlu1 %v3167_v21, %s3560_s2 }
 0x114   :  { %v398_v29 = vadd.f32 %v397_v27, %v3894_v28  ;;  %v399_v30 = vpop.f32.mrb[15].mxu0 }
 0x115   :  { %v400_v31 = vadd.f32 %v399_v30, %v3907_v33 }
 0x116   :  { %v3986_v32 = vmax.f32 %v394_v23, %v398_v29 }
 0x117   :  { %v3988_v34 = vmax.f32 %v396_v26, %v400_v31 }
 0x119   :  { %v403_v35 = vpop.f32.mrb[16].mxu0  ;;  %v3172_v36 = vpack.i.bf16 %v3988_v34, %v3986_v32 }
 0x11a   :  { %v404_v37 = vadd.f32 %v403_v35, %v3894_v28  ;;  %v405_v38 = vpop.f32.mrb[17].mxu0 }
 0x11b   :  { %v406_v39 = vadd.f32 %v405_v38, %v3907_v33  ;;  %v407_v40 = vpop.f32.mrb[18].mxu0  ;;  %3173 = vrot.lane.b32.xlu1 %v3172_v36, %s3560_s2 }
 0x11c   :  { %v408_v41 = vadd.f32 %v407_v40, %v3894_v28  ;;  %v409_v42 = vpop.f32.mrb[19].mxu0 }
 0x11d   :  { %v410_v43 = vadd.f32 %v409_v42, %v3907_v33 }
 0x11e   :  { %v3997_v44 = vmax.f32 %v404_v37, %v408_v41 }
 0x11f   :  { %v3999_v46 = vmax.f32 %v406_v39, %v410_v43 }
 0x121   :  { %v413_v48 = vpop.f32.mrb[20].mxu0  ;;  %v3177_v49 = vpack.i.bf16 %v3999_v46, %v3997_v44 }
 0x122   :  { %v414_v50 = vadd.f32 %v413_v48, %v3894_v28  ;;  %v415_v51 = vpop.f32.mrb[21].mxu0 }
 0x123   :  { %v416_v52 = vadd.f32 %v415_v51, %v3907_v33  ;;  %v417_v53 = vpop.f32.mrb[22].mxu0  ;;  %3178 = vrot.lane.b32.xlu0 %v3177_v49, %s3560_s2 }
 0x124   :  { %v418_v54 = vadd.f32 %v417_v53, %v3894_v28  ;;  %v419_v55 = vpop.f32.mrb[23].mxu0 }
 0x125   :  { %v420_v56 = vadd.f32 %v419_v55, %v3907_v33 }
 0x126   :  { %v4008_v57 = vmax.f32 %v414_v50, %v418_v54 }
 0x127   :  { %v4010_v58 = vmax.f32 %v416_v52, %v420_v56 }
 0x129   :  { %v423_v59 = vpop.f32.mrb[24].mxu0  ;;  %v3182_v60 = vpack.i.bf16 %v4010_v58, %v4008_v57 }
 0x12a   :  { %v424_v61 = vadd.f32 %v423_v59, %v3894_v28  ;;  %v425_v62 = vpop.f32.mrb[25].mxu0 }
 0x12b   :  { %v426_v63 = vadd.f32 %v425_v62, %v3907_v33  ;;  %v427_v0 = vpop.f32.mrb[26].mxu0  ;;  %3183 = vrot.lane.b32.xlu1 %v3182_v60, %s3560_s2 }
 0x12c   :  { %v428_v2 = vadd.f32 %v427_v0, %v3894_v28  ;;  %v429_v4 = vpop.f32.mrb[27].mxu0 }
 0x12d   :  { %v430_v5 = vadd.f32 %v429_v4, %v3907_v33 }
 0x12e   :  { %v4019_v6 = vmax.f32 %v424_v61, %v428_v2 }
 0x12f   :  { %v4021_v7 = vmax.f32 %v426_v63, %v430_v5 }
 0x131   :  { %v433_v8 = vpop.f32.mrb[28].mxu0  ;;  %v3187_v9 = vpack.i.bf16 %v4021_v7, %v4019_v6 }
 0x132   :  { %v434_v10 = vadd.f32 %v433_v8, %v3894_v28  ;;  %v435_v11 = vpop.f32.mrb[29].mxu0 }
 0x133   :  { %v436_v12 = vadd.f32 %v435_v11, %v3907_v33  ;;  %v437_v13 = vpop.f32.mrb[30].mxu0  ;;  %3188 = vrot.lane.b32.xlu0 %v3187_v9, %s3560_s2 }
 0x134   :  { %v438_v14 = vadd.f32 %v437_v13, %v3894_v28  ;;  %v439_v15 = vpop.f32.mrb[31].mxu0 }
 0x135   :  { %v440_v16 = vadd.f32 %v439_v15, %v3907_v33 }
 0x136   :  { %v4030_v19 = vmax.f32 %v434_v10, %v438_v14 }
 0x137   :  { %v4032_v21 = vmax.f32 %v436_v12, %v440_v16 }
 0x139   :  { %v443_v23 = vpop.f32.mrb[32].mxu0  ;;  %v3192_v25 = vpack.i.bf16 %v4032_v21, %v4030_v19 }
 0x13a   :  { %v444_v26 = vadd.f32 %v443_v23, %v3894_v28  ;;  %v445_v27 = vpop.f32.mrb[33].mxu0 }
 0x13b   :  { %v446_v29 = vadd.f32 %v445_v27, %v3907_v33  ;;  %v447_v30 = vpop.f32.mrb[34].mxu0  ;;  %3193 = vrot.lane.b32.xlu1 %v3192_v25, %s3560_s2 }
 0x13c   :  { %v448_v31 = vadd.f32 %v447_v30, %v3894_v28  ;;  %v449_v35 = vpop.f32.mrb[35].mxu0 }
 0x13d   :  { %v450_v36 = vadd.f32 %v449_v35, %v3907_v33 }
 0x13e   :  { %v4041_v37 = vmax.f32 %v444_v26, %v448_v31 }
 0x13f   :  { %v4043_v38 = vmax.f32 %v446_v29, %v450_v36 }
 0x141   :  { %v453_v39 = vpop.f32.mrb[36].mxu0  ;;  %v3197_v40 = vpack.i.bf16 %v4043_v38, %v4041_v37 }
 0x142   :  { %v454_v41 = vadd.f32 %v453_v39, %v3894_v28  ;;  %v455_v42 = vpop.f32.mrb[37].mxu0 }
 0x143   :  { %v456_v43 = vadd.f32 %v455_v42, %v3907_v33  ;;  %v457_v48 = vpop.f32.mrb[38].mxu0  ;;  %3198 = vrot.lane.b32.xlu0 %v3197_v40, %s3560_s2 }
 0x144   :  { %v458_v49 = vadd.f32 %v457_v48, %v3894_v28  ;;  %v459_v50 = vpop.f32.mrb[39].mxu0 }
 0x145   :  { %v460_v51 = vadd.f32 %v459_v50, %v3907_v33 }
 0x146   :  { %v4052_v52 = vmax.f32 %v454_v41, %v458_v49 }
 0x147   :  { %v4054_v53 = vmax.f32 %v456_v43, %v460_v51 }
 0x149   :  { %v463_v54 = vpop.f32.mrb[40].mxu0  ;;  %v3202_v55 = vpack.i.bf16 %v4054_v53, %v4052_v52 }
 0x14a   :  { %v464_v56 = vadd.f32 %v463_v54, %v3894_v28  ;;  %v465_v59 = vpop.f32.mrb[41].mxu0 }
 0x14b   :  { %v466_v60 = vadd.f32 %v465_v59, %v3907_v33  ;;  %v467_v61 = vpop.f32.mrb[42].mxu0  ;;  %3203 = vrot.lane.b32.xlu1 %v3202_v55, %s3560_s2  ;;  %v3389_v59 = vld [vmem:[%s4727_s3 + $0x1e0] ss:$8 sps:$4 sm:$0xff]  }
 0x14c   :  { %v468_v62 = vadd.f32 %v467_v61, %v3894_v28  ;;  %v469_v63 = vpop.f32.mrb[43].mxu0  ;;  %v3396_v61 = vld [vmem:[%s4727_s3 + $0x1f4] ss:$8 sps:$4 sm:$0xff]  }
 0x14d   :  { %v470_v0 = vadd.f32 %v469_v63, %v3907_v33 }
 0x14e   :  { %v4063_v2 = vmax.f32 %v464_v56, %v468_v62 }
 0x14f   :  { %v4065_v4 = vmax.f32 %v466_v60, %v470_v0 }
 0x151   :  { %v473_v5 = vpop.f32.mrb[44].mxu0  ;;  %v3207_v8 = vpack.i.bf16 %v4065_v4, %v4063_v2 }
 0x152   :  { %v474_v9 = vadd.f32 %v473_v5, %v3894_v28  ;;  %v475_v10 = vpop.f32.mrb[45].mxu0 }
 0x153   :  { %v476_v11 = vadd.f32 %v475_v10, %v3907_v33  ;;  %v477_v12 = vpop.f32.mrb[46].mxu0  ;;  %3208 = vrot.lane.b32.xlu0 %v3207_v8, %s3560_s2 }
 0x154   :  { %v478_v13 = vadd.f32 %v477_v12, %v3894_v28  ;;  %v479_v14 = vpop.f32.mrb[47].mxu0 }
 0x155   :  { %v480_v15 = vadd.f32 %v479_v14, %v3907_v33  ;;  %v3402_v14 = vld [vmem:[%s4727_s3 + $0x214] ss:$8 sps:$4 sm:$0xff]  }
 0x156   :  { %v4074_v16 = vmax.f32 %v474_v9, %v478_v13  ;;  %v3397_v13 = vld [vmem:[%s4727_s3 + $0x200] ss:$8 sps:$4 sm:$0xff]  }
 0x157   :  { %v4076_v23 = vmax.f32 %v476_v11, %v480_v15 }
 0x159   :  { %v3212_v25 = vpack.i.bf16 %v4076_v23, %v4074_v16 }
 0x15b   :  { %3213 = vrot.lane.b32.xlu1 %v3212_v25, %s3560_s2 }
 0x175   :  { %v3159_v26 = vpop.permute.xlu0 %3158 }
 0x176   :  { %v3161_v27 = vunpack.i.h.bf16 %v3159_v26  ;;  %v3160_v29 = vunpack.i.l.bf16 %v3159_v26 }
 0x178   :  { %v579_v30 = vsel %vm578_vm3, %v3160_v29, %v3161_v27  ;;  %v616_v28 = vmax.f32 %v3930_v47, %v3161_v27  ;;  %v3383_v47 = vld [vmem:[%s4727_s3 + $0x1d0] ss:$8 sps:$4 sm:$0xff]  }
 0x179   :  { %v615_v36 = vmax.f32 %v3925_v45, %v579_v30  ;;  %v3391_v45 = vld [vmem:[%s4727_s3 + $0x1e4] ss:$8 sps:$4 sm:$0xff]  }
 0x17a   :  { %v640_v42 = vmax.f32 %v616_v28, 0.0 }
 0x17b   :  { %v639_v48 = vmax.f32 %v615_v36, 0.0  ;;  %v3403_v36 = vld [vmem:[%s4727_s3 + $0x220] ss:$8 sps:$4 sm:$0xff]  }
 0x17d   :  { %v3164_v31 = vpop.permute.xlu0 %3163 }
 0x17e   :  { %v3166_v35 = vunpack.i.h.bf16 %v3164_v31  ;;  %v3165_v33 = vunpack.i.l.bf16 %v3164_v31  ;;  %v3405_v31 = vld [vmem:[%s4727_s3 + $0x224] ss:$8 sps:$4 sm:$0xff]  }
 0x180   :  { %v618_v39 = vmax.f32 %v3961_v3, %v3166_v35  ;;  %v580_v40 = vsel %vm578_vm3, %v3165_v33, %v3166_v35 }
 0x181   :  { %v617_v41 = vmax.f32 %v3956_v1, %v580_v40 }
 0x182   :  { %v642_v43 = vmax.f32 %v618_v39, 0.0  ;;  %v3408_v39 = vld [vmem:[%s4727_s3 + $0x234] ss:$8 sps:$4 sm:$0xff]  }
 0x183   :  { %v641_v49 = vmax.f32 %v617_v41, 0.0 }
 0x184   :  { %v664_v50 = vpack.c.bf16 %v642_v43, %v640_v42 }
 0x185   :  { %v3169_v51 = vpop.permute.xlu1 %3168  ;;  %v663_v54 = vpack.c.bf16 %v641_v49, %v639_v48 }
 0x186   :  { %v3171_v3 = vunpack.i.h.bf16 %v3169_v51  ;;  %v3170_v55 = vunpack.i.l.bf16 %v3169_v51  ;;  %2797 = vmatprep.mubr.msk.bf16.mxu1 %vm883_vm4, %v664_v50  ;;  %v3411_v50 = vld [vmem:[%s4727_s3 + $0x244] ss:$8 sps:$4 sm:$0xff]  }
 0x187   :  { %1172 = vmatmul.mubr.bf16.vlgmr.msra.gmra.mrb[0].mxu1 %v663_v54 }
 0x188   :  { %v620_v1 = vmax.f32 %v3977_v18, %v3171_v3  ;;  %v581_v56 = vsel %vm578_vm3, %v3170_v55, %v3171_v3  ;;  %1399 = vmatpush1.bf16.msra.mxu1 %v3383_v47  ;;  %v3394_v18 = vld [vmem:[%s4727_s3 + $0x1f0] ss:$8 sps:$4 sm:$0xff]   ;;  %v3414_v3 = vld [vmem:[%s4727_s3 + $0x254] ss:$8 sps:$4 sm:$0xff]  }
 0x189   :  { %v619_v60 = vmax.f32 %v3975_v17, %v581_v56  ;;  %1400 = vmatprep.subr.bf16.mxu1 %v3391_v45  ;;  %v3399_v17 = vld [vmem:[%s4727_s3 + $0x204] ss:$8 sps:$4 sm:$0xff]   ;;  %v3409_v45 = vld [vmem:[%s4727_s3 + $0x240] ss:$8 sps:$4 sm:$0xff]  }
 0x18a   :  { %v644_v62 = vmax.f32 %v620_v1, 0.0 }
 0x18b   :  { %v643_v63 = vmax.f32 %v619_v60, 0.0 }
 0x18c   :  { %v701_v0 = vpack.c.bf16 %v644_v62, %v642_v43  ;;  %1401 = vmatpush1.bf16.msra.mxu1 %v3389_v59 }
 0x18d   :  { %v700_v5 = vpack.c.bf16 %v643_v63, %v641_v49  ;;  %v3174_v8 = vpop.permute.xlu1 %3173  ;;  %1402 = vmatprep.subr.bf16.mxu1 %v3396_v61 }
 0x18e   :  { %v3176_v9 = vunpack.i.h.bf16 %v3174_v8  ;;  %v3175_v10 = vunpack.i.l.bf16 %v3174_v8  ;;  %2762 = vmatprep.mubr.msk.bf16.mxu0 %vm883_vm4, %v701_v0  ;;  %v3420_v8 = vld [vmem:[%s4727_s3 + $0x274] ss:$8 sps:$4 sm:$0xff]  }
 0x18f   :  { %936 = vmatmul.mubr.bf16.vlgmr.msra.gmra.mrb[48].mxu0 %v700_v5  ;;  %v3415_v5 = vld [vmem:[%s4727_s3 + $0x260] ss:$8 sps:$4 sm:$0xff]  }
 0x190   :  { %v622_v11 = vmax.f32 %v3988_v34, %v3176_v9  ;;  %v582_v12 = vsel %vm578_vm3, %v3175_v10, %v3176_v9  ;;  %1403 = vmatpush1.bf16.msra.mxu1 %v3394_v18  ;;  %v3400_v34 = vld [vmem:[%s4727_s3 + $0x210] ss:$8 sps:$4 sm:$0xff]  }
 0x191   :  { %1404 = vmatprep.subr.bf16.mxu1 %v3399_v17  ;;  %v621_v15 = vmax.f32 %v3986_v32, %v582_v12 }
 0x192   :  { %v646_v25 = vmax.f32 %v622_v11, 0.0 }
 0x193   :  { %v645_v26 = vmax.f32 %v621_v15, 0.0 }
 0x194   :  { %v4119_v27 = vpack.c.bf16 %v646_v25, %v644_v62  ;;  %1405 = vmatpush1.bf16.msra.mxu1 %v3397_v13  ;;  %v3417_v62 = vld [vmem:[%s4727_s3 + $0x264] ss:$8 sps:$4 sm:$0xff]  }
 0x195   :  { %v3179_v29 = vpop.permute.xlu0 %3178  ;;  %1406 = vmatprep.subr.bf16.mxu1 %v3402_v14  ;;  %v4124_v30 = vpack.c.bf16 %v645_v26, %v643_v63  ;;  %v3423_v14 = vld [vmem:[%s4727_s3 + $0x284] ss:$8 sps:$4 sm:$0xff]  }
 0x196   :  { %v3181_v28 = vunpack.i.h.bf16 %v3179_v29  ;;  %v3180_v35 = vunpack.i.l.bf16 %v3179_v29  ;;  %2798 = vmatprep.mubr.msk.bf16.mxu1 %vm883_vm4, %v4119_v27  ;;  %v3426_v29 = vld [vmem:[%s4727_s3 + $0x294] ss:$8 sps:$4 sm:$0xff]  }
 0x197   :  { %1182 = vmatmul.mubr.bf16.gmra.mrb[4].mxu1 %v4124_v30 }
 0x198   :  { %v624_v32 = vmax.f32 %v3999_v46, %v3181_v28  ;;  %v583_v33 = vsel %vm578_vm3, %v3180_v35, %v3181_v28  ;;  %1407 = vmatpush1.bf16.msra.mxu1 %v3400_v34  ;;  %v3406_v46 = vld [vmem:[%s4727_s3 + $0x230] ss:$8 sps:$4 sm:$0xff]   ;;  %v3421_v34 = vld [vmem:[%s4727_s3 + $0x280] ss:$8 sps:$4 sm:$0xff]  }
 0x199   :  { %1408 = vmatprep.subr.bf16.mxu1 %v3405_v31  ;;  %v623_v40 = vmax.f32 %v3997_v44, %v583_v33 }
 0x19a   :  { %v648_v41 = vmax.f32 %v624_v32, 0.0 }
 0x19b   :  { %v647_v42 = vmax.f32 %v623_v40, 0.0 }
 0x19c   :  { %v4141_v43 = vpack.c.bf16 %v648_v41, %v646_v25  ;;  %1409 = vmatpush1.bf16.msra.mxu1 %v3403_v36 }
 0x19d   :  { %v3184_v48 = vpop.permute.xlu1 %3183  ;;  %1410 = vmatprep.subr.bf16.mxu1 %v3408_v39  ;;  %v4146_v49 = vpack.c.bf16 %v647_v42, %v645_v26  ;;  %v3429_v39 = vld [vmem:[%s4727_s3 + $0x2a4] ss:$8 sps:$4 sm:$0xff]  }
 0x19e   :  { %v3186_v47 = vunpack.i.h.bf16 %v3184_v48  ;;  %v3185_v51 = vunpack.i.l.bf16 %v3184_v48  ;;  %2763 = vmatprep.mubr.msk.bf16.mxu0 %vm883_vm4, %v4141_v43  ;;  %v3427_v48 = vld [vmem:[%s4727_s3 + $0x2a0] ss:$8 sps:$4 sm:$0xff]  }
 0x19f   :  { %946 = vmatmul.mubr.bf16.gmra.mrb[52].mxu0 %v4146_v49 }
 0x1a0   :  { %v626_v44 = vmax.f32 %v4010_v58, %v3186_v47  ;;  %v584_v54 = vsel %vm578_vm3, %v3185_v51, %v3186_v47  ;;  %1411 = vmatpush1.bf16.msra.mxu1 %v3406_v46  ;;  %v3412_v58 = vld [vmem:[%s4727_s3 + $0x250] ss:$8 sps:$4 sm:$0xff]  }
 0x1a1   :  { %1412 = vmatprep.subr.bf16.mxu1 %v3411_v50  ;;  %v625_v55 = vmax.f32 %v4008_v57, %v584_v54 }
 0x1a2   :  { %v650_v1 = vmax.f32 %v626_v44, 0.0 }
 0x1a3   :  { %v649_v56 = vmax.f32 %v625_v55, 0.0  ;;  %v3437_v55 = vld [vmem:[%s4727_s3 + $0x2cc] ss:$8 sps:$4 sm:$0xff]  }
 0x1a4   :  { %v4163_v59 = vpack.c.bf16 %v650_v1, %v648_v41  ;;  %1413 = vmatpush1.bf16.msra.mxu1 %v3409_v45 }
 0x1a5   :  { %v3189_v60 = vpop.permute.xlu0 %3188  ;;  %1414 = vmatprep.subr.bf16.mxu1 %v3414_v3  ;;  %v4168_v61 = vpack.c.bf16 %v649_v56, %v647_v42  ;;  %v3434_v3 = vld [vmem:[%s4727_s3 + $0x2bc] ss:$8 sps:$4 sm:$0xff]  }
 0x1a6   :  { %v3191_v63 = vunpack.i.h.bf16 %v3189_v60  ;;  %v3190_v0 = vunpack.i.l.bf16 %v3189_v60  ;;  %2799 = vmatprep.mubr.msk.bf16.mxu1 %vm883_vm4, %v4163_v59 }
 0x1a7   :  { %1192 = vmatmul.mubr.bf16.gmra.mrb[8].mxu1 %v4168_v61 }
 0x1a8   :  { %v628_v57 = vmax.f32 %v4021_v7, %v3191_v63  ;;  %v585_v18 = vsel %vm578_vm3, %v3190_v0, %v3191_v63  ;;  %1415 = vmatpush1.bf16.msra.mxu1 %v3412_v58  ;;  %v3418_v7 = vld [vmem:[%s4727_s3 + $0x270] ss:$8 sps:$4 sm:$0xff]   ;;  %v3440_v58 = vld [vmem:[%s4727_s3 + $0x2dc] ss:$8 sps:$4 sm:$0xff]  }
 0x1a9   :  { %1416 = vmatprep.subr.bf16.mxu1 %v3417_v62  ;;  %v627_v17 = vmax.f32 %v4019_v6, %v585_v18  ;;  %v3438_v62 = vld [vmem:[%s4727_s3 + $0x2d8] ss:$8 sps:$4 sm:$0xff]   ;;  %v3446_v18 = vld [vmem:[%s4727_s3 + $0x2fc] ss:$8 sps:$4 sm:$0xff]  }
 0x1aa   :  { %v652_v9 = vmax.f32 %v628_v57, 0.0  ;;  %v3441_v57 = vld [vmem:[%s4727_s3 + $0x2e8] ss:$8 sps:$4 sm:$0xff]  }
 0x1ab   :  { %v651_v10 = vmax.f32 %v627_v17, 0.0  ;;  %v3449_v17 = vld [vmem:[%s4727_s3 + $0x30c] ss:$8 sps:$4 sm:$0xff]  }
 0x1ac   :  { %v4185_v11 = vpack.c.bf16 %v652_v9, %v650_v1  ;;  %1417 = vmatpush1.bf16.msra.mxu1 %v3415_v5 }
 0x1ad   :  { %v3194_v12 = vpop.permute.xlu1 %3193  ;;  %1418 = vmatprep.subr.bf16.mxu1 %v3420_v8  ;;  %v4190_v13 = vpack.c.bf16 %v651_v10, %v649_v56  ;;  %v3435_v56 = vld [vmem:[%s4727_s3 + $0x2c8] ss:$8 sps:$4 sm:$0xff]   ;;  %v3444_v8 = vld [vmem:[%s4727_s3 + $0x2f8] ss:$8 sps:$4 sm:$0xff]  }
 0x1ae   :  { %v3196_v15 = vunpack.i.h.bf16 %v3194_v12  ;;  %v3195_v25 = vunpack.i.l.bf16 %v3194_v12  ;;  %2764 = vmatprep.mubr.msk.bf16.mxu0 %vm883_vm4, %v4185_v11 }
 0x1af   :  { %956 = vmatmul.mubr.bf16.gmra.mrb[56].mxu0 %v4190_v13 }
 0x1b0   :  { %v630_v6 = vmax.f32 %v4032_v21, %v3196_v15  ;;  %v586_v26 = vsel %vm578_vm3, %v3195_v25, %v3196_v15  ;;  %1419 = vmatpush1.bf16.msra.mxu1 %v3418_v7  ;;  %v3424_v21 = vld [vmem:[%s4727_s3 + $0x290] ss:$8 sps:$4 sm:$0xff]   ;;  %v3455_v25 = vld [vmem:[%s4727_s3 + $0x32c] ss:$8 sps:$4 sm:$0xff]  }
 0x1b1   :  { %1420 = vmatprep.subr.bf16.mxu1 %v3423_v14  ;;  %v629_v31 = vmax.f32 %v4030_v19, %v586_v26  ;;  %v2829_v19 = vld [vmem:[%s4727_s3 + $0x2b0] sm:$0x77]  ;;  %v3450_v14 = vld [vmem:[%s4727_s3 + $0x318] ss:$8 sps:$4 sm:$0xff]   ;;  %v3458_v26 = vld [vmem:[%s4727_s3 + $0x33c] ss:$8 sps:$4 sm:$0xff]  }
 0x1b2   :  { %v654_v28 = vmax.f32 %v630_v6, 0.0  ;;  %v2859_v50 = vcombine.high %v2829_v19, %v2829_v19  ;;  %v2858_v51 = vcombine.low %v2829_v19, %v2829_v19  ;;  %v3447_v7 = vld [vmem:[%s4727_s3 + $0x308] ss:$8 sps:$4 sm:$0xff]  }
 0x1b3   :  { %v653_v35 = vmax.f32 %v629_v31, 0.0  ;;  %v3453_v6 = vld [vmem:[%s4727_s3 + $0x328] ss:$8 sps:$4 sm:$0xff]   ;;  %v3464_v31 = vld [vmem:[%s4727_s3 + $0x35c] ss:$8 sps:$4 sm:$0xff]  }
 0x1b4   :  { %v4207_v32 = vpack.c.bf16 %v654_v28, %v652_v9  ;;  %1421 = vmatpush1.bf16.msra.mxu1 %v3421_v34  ;;  %v3456_v34 = vld [vmem:[%s4727_s3 + $0x338] ss:$8 sps:$4 sm:$0xff]   ;;  %v3471_v19 = vld [vmem:[%s4727_s3 + $0x388] ss:$8 sps:$4 sm:$0xff]  }
 0x1b5   :  { %v3199_v33 = vpop.permute.xlu0 %3198  ;;  %1422 = vmatprep.subr.bf16.mxu1 %v3426_v29  ;;  %v4212_v36 = vpack.c.bf16 %v653_v35, %v651_v10  ;;  %v3461_v29 = vld [vmem:[%s4727_s3 + $0x34c] ss:$8 sps:$4 sm:$0xff]  }
 0x1b6   :  { %v3201_v40 = vunpack.i.h.bf16 %v3199_v33  ;;  %v3200_v41 = vunpack.i.l.bf16 %v3199_v33  ;;  %2800 = vmatprep.mubr.msk.bf16.mxu1 %vm883_vm4, %v4207_v32  ;;  %v3470_v33 = vld [vmem:[%s4727_s3 + $0x37c] ss:$8 sps:$4 sm:$0xff]  }
 0x1b7   :  { %1202 = vmatmul.mubr.bf16.gmra.mrb[12].mxu1 %v4212_v36 }
 0x1b8   :  { %v632_v42 = vmax.f32 %v4043_v38, %v3201_v40  ;;  %v587_v46 = vsel %vm578_vm3, %v3200_v41, %v3201_v40  ;;  %1423 = vmatpush1.bf16.msra.mxu1 %v3424_v21  ;;  %2861 = vmatprep.mubr.msk.bf16.mxu1 %vm883_vm4, %v4119_v27  ;;  %v1393_v27 = vsel %vm896_vm2, %v2858_v51, 0  ;;  %v3465_v21 = vld [vmem:[%s4727_s3 + $0x368] ss:$8 sps:$4 sm:$0xff]   ;;  %v3473_v40 = vld [vmem:[%s4727_s3 + $0x38c] ss:$8 sps:$4 sm:$0xff]  }
 0x1b9   :  { %1424 = vmatprep.subr.bf16.mxu1 %v3429_v39  ;;  %v631_v47 = vmax.f32 %v4041_v37, %v587_v46  ;;  %v3432_v37 = vld [vmem:[%s4727_s3 + $0x2b8] ss:$8 sps:$4 sm:$0xff]   ;;  %v3481_v51 = vld [vmem:[%s4727_s3 + $0x3b4] ss:$8 sps:$4 sm:$0xff]  }
 0x1ba   :  { %v656_v44 = vmax.f32 %v632_v42, 0.0  ;;  %v3468_v39 = vld [vmem:[%s4727_s3 + $0x378] ss:$8 sps:$4 sm:$0xff]  }
 0x1bb   :  { %v655_v54 = vmax.f32 %v631_v47, 0.0  ;;  %v2893_v41 = vld [vmem:[%s4727_s3 + $0x398] sm:$0x77]  ;;  %v3476_v47 = vld [vmem:[%s4727_s3 + $0x3a0] ss:$8 sps:$4 sm:$0xff]  }
 0x1bc   :  { %v4231_v45 = vpack.c.bf16 %v656_v44, %v654_v28  ;;  %1425 = vmatpush1.bf16.msra.mxu1 %v3427_v48  ;;  %v3462_v28 = vld [vmem:[%s4727_s3 + $0x358] ss:$8 sps:$4 sm:$0xff]   ;;  %v2923_v42 = vcombine.high %v2893_v41, %v2893_v41  ;;  %v2922_v46 = vcombine.low %v2893_v41, %v2893_v41 }
 0x1bd   :  { %2860 = vmatprep.subr.msk.bf16.mxu1 %vm896_vm2, %v2859_v50  ;;  %v4234_v38 = vpack.c.bf16 %v655_v54, %v653_v35  ;;  %v3204_v1 = vpop.permute.xlu1 %3203  ;;  %v3467_v35 = vld [vmem:[%s4727_s3 + $0x36c] ss:$8 sps:$4 sm:$0xff]  }
 0x1be   :  { %2765 = vmatprep.mubr.msk.bf16.mxu0 %vm883_vm4, %v4231_v45  ;;  %v3206_v60 = vunpack.i.h.bf16 %v3204_v1  ;;  %v3205_v0 = vunpack.i.l.bf16 %v3204_v1  ;;  %v1668_v48 = vsel %vm896_vm2, %v2922_v46, 0  ;;  %v3478_v50 = vld [vmem:[%s4727_s3 + $0x3a4] ss:$8 sps:$4 sm:$0xff]   ;;  %v3485_v1 = vld [vmem:[%s4727_s3 + $0x3d0] ss:$8 sps:$4 sm:$0xff]  }
 0x1bf   :  { %966 = vmatmul.mubr.bf16.gmra.mrb[60].mxu0 %v4234_v38 }
 0x1c0   :  { %1427 = vmatpush1.bf16.msra.mxu1 %v1393_v27  ;;  %v4265_v63 = vmax.f32 %v4054_v53, %v3206_v60  ;;  %v588_v53 = vsel %vm578_vm3, %v3205_v0, %v3206_v60  ;;  %v3484_v27 = vld [vmem:[%s4727_s3 + $0x3c4] ss:$8 sps:$4 sm:$0xff]  }
 0x1c1   :  { %1673 = vmatprep.subr.bf16.mxu1 %v3434_v3  ;;  %v633_v9 = vmax.f32 %v4052_v52, %v588_v53  ;;  %v3452_v52 = vld [vmem:[%s4727_s3 + $0x31c] ss:$8 sps:$4 sm:$0xff]   ;;  %v3500_v53 = vld [vmem:[%s4727_s3 + $0x420] ss:$8 sps:$4 sm:$0xff]  }
 0x1c2   :  { %v658_v5 = vmax.f32 %v4265_v63, 0.0  ;;  %v3494_v63 = vld [vmem:[%s4727_s3 + $0x400] ss:$8 sps:$4 sm:$0xff]  }
 0x1c3   :  { %1431 = vmatmul.mubr.bf16.vlgmr.msra.gmra.mrb[0].mxu1 %v4124_v30  ;;  %v3443_v30 = vld [vmem:[%s4727_s3 + $0x2ec] ss:$8 sps:$4 sm:$0xff]   ;;  %v4295_v12 = vmax.f32 %v633_v9, 0.0  ;;  %v3506_v9 = vld [vmem:[%s4727_s3 + $0x440] ss:$8 sps:$4 sm:$0xff]  }
 0x1c4   :  { %2862 = vmatprep.mubr.msk.bf16.mxu1 %vm883_vm4, %v4163_v59  ;;  %1674 = vmatpush1.bf16.msra.mxu1 %v3432_v37  ;;  %v4287_v10 = vpack.c.bf16 %v658_v5, %v656_v44  ;;  %v3482_v37 = vld [vmem:[%s4727_s3 + $0x3c0] ss:$8 sps:$4 sm:$0xff]  }
 0x1c5   :  { %1675 = vmatprep.subr.bf16.mxu1 %v3437_v55  ;;  %v4304_v15 = vpack.c.bf16 %v4295_v12, %v655_v54  ;;  %v3209_v44 = vpop.permute.xlu0 %3208  ;;  %v3479_v54 = vld [vmem:[%s4727_s3 + $0x3b0] ss:$8 sps:$4 sm:$0xff]  }
 0x1c6   :  { %v3211_v3 = vunpack.i.h.bf16 %v3209_v44  ;;  %v3210_v55 = vunpack.i.l.bf16 %v3209_v44 }
 0x1c8   :  { %1676 = vmatpush1.bf16.msra.mxu1 %v3435_v56  ;;  %v3490_v56 = vld [vmem:[%s4727_s3 + $0x3e4] ss:$8 sps:$4 sm:$0xff]  }
 0x1c9   :  { %1677 = vmatprep.subr.bf16.mxu1 %v3440_v58 }
 0x1cb   :  { %1441 = vmatmul.mubr.bf16.gmra.mrb[4].mxu1 %v4168_v61 }
 0x1cc   :  { %2863 = vmatprep.mubr.msk.bf16.mxu1 %vm883_vm4, %v4207_v32  ;;  %1678 = vmatpush1.bf16.msra.mxu1 %v3438_v62 }
 0x1cd   :  { %1679 = vmatprep.subr.bf16.mxu1 %v3443_v30  ;;  %v3491_v30 = vld [vmem:[%s4727_s3 + $0x3f0] ss:$8 sps:$4 sm:$0xff]  }
 0x1d0   :  { %1680 = vmatpush1.bf16.msra.mxu1 %v3441_v57  ;;  %v3499_v57 = vld [vmem:[%s4727_s3 + $0x414] ss:$8 sps:$4 sm:$0xff]  }
 0x1d1   :  { %1681 = vmatprep.subr.bf16.mxu1 %v3446_v18  ;;  %v3497_v18 = vld [vmem:[%s4727_s3 + $0x410] ss:$8 sps:$4 sm:$0xff]  }
 0x1d3   :  { %1451 = vmatmul.mubr.bf16.gmra.mrb[8].mxu1 %v4212_v36 }
 0x1d4   :  { %2864 = vmatprep.mubr.msk.bf16.mxu1 %vm883_vm4, %v4287_v10  ;;  %1682 = vmatpush1.bf16.msra.mxu1 %v3444_v8  ;;  %v3505_v8 = vld [vmem:[%s4727_s3 + $0x434] ss:$8 sps:$4 sm:$0xff]  }
 0x1d5   :  { %1683 = vmatprep.subr.bf16.mxu1 %v3449_v17  ;;  %v3508_v17 = vld [vmem:[%s4727_s3 + $0x444] ss:$8 sps:$4 sm:$0xff]  }
 0x1d8   :  { %1684 = vmatpush1.bf16.msra.mxu1 %v3447_v7  ;;  %v3511_v7 = vld [vmem:[%s4727_s3 + $0x454] ss:$8 sps:$4 sm:$0xff]  }
 0x1d9   :  { %1685 = vmatprep.subr.bf16.mxu1 %v3452_v52  ;;  %v3514_v52 = vld [vmem:[%s4727_s3 + $0x464] ss:$8 sps:$4 sm:$0xff]  }
 0x1db   :  { %1461 = vmatmul.mubr.bf16.gmra.mrb[12].mxu1 %v4304_v15 }
 0x1dc   :  { %1686 = vmatpush1.bf16.msra.mxu1 %v3450_v14  ;;  %2925 = vmatprep.mubr.msk.bf16.mxu1 %vm883_vm4, %v4141_v43  ;;  %v3459_v43 = vld [vmem:[%s4727_s3 + $0x348] ss:$8 sps:$4 sm:$0xff]  }
 0x1dd   :  { %1687 = vmatprep.subr.bf16.mxu1 %v3455_v25  ;;  %v3512_v14 = vld [vmem:[%s4727_s3 + $0x460] ss:$8 sps:$4 sm:$0xff]   ;;  %v3517_v25 = vld [vmem:[%s4727_s3 + $0x474] ss:$8 sps:$4 sm:$0xff]  }
 0x1e0   :  { %1688 = vmatpush1.bf16.msra.mxu1 %v3453_v6  ;;  %v2957_v6 = vld [vmem:[%s4727_s3 + $0x480] sm:$0x77] }
 0x1e1   :  { %1689 = vmatprep.subr.bf16.mxu1 %v3458_v26  ;;  %v3515_v26 = vld [vmem:[%s4727_s3 + $0x470] ss:$8 sps:$4 sm:$0xff]  }
 0x1e4   :  { %1690 = vmatpush1.bf16.msra.mxu1 %v3456_v34  ;;  %v2987_v34 = vcombine.high %v2957_v6, %v2957_v6 }
 0x1e5   :  { %1691 = vmatprep.subr.bf16.mxu1 %v3461_v29  ;;  %v2986_v29 = vcombine.low %v2957_v6, %v2957_v6 }
 0x1e8   :  { %1692 = vmatpush1.bf16.msra.mxu1 %v3459_v43  ;;  %v1943_v43 = vsel %vm896_vm2, %v2986_v29, 0 }
 0x1e9   :  { %1693 = vmatprep.subr.bf16.mxu1 %v3464_v31  ;;  %v3214_v31 = vpop.permute.xlu1 %3213 }
 0x1ec   :  { %1694 = vmatpush1.bf16.msra.mxu1 %v3462_v28  ;;  %v3216_v28 = vunpack.i.h.bf16 %v3214_v31 }
 0x1ed   :  { %1695 = vmatprep.subr.bf16.mxu1 %v3467_v35 }
 0x1ee   :  { %v638_v35 = vmax.f32 %v4076_v23, %v3216_v28 }
 0x1f0   :  { %1696 = vmatpush1.bf16.msra.mxu1 %v3465_v21  ;;  %v3215_v21 = vunpack.i.l.bf16 %v3214_v31 }
 0x1f1   :  { %1697 = vmatprep.subr.bf16.mxu1 %v3470_v33  ;;  %v662_v33 = vmax.f32 %v638_v35, 0.0 }
 0x1f4   :  { %1698 = vmatpush1.bf16.msra.mxu1 %v3468_v39  ;;  %v590_v39 = vsel %vm578_vm3, %v3215_v21, %v3216_v28 }
 0x1f5   :  { %1699 = vmatprep.subr.bf16.mxu1 %v3473_v40  ;;  %v637_v40 = vmax.f32 %v4074_v16, %v590_v39 }
 0x1f8   :  { %1700 = vmatpush1.bf16.msra.mxu1 %v3471_v19 }
 0x1f9   :  { %2924 = vmatprep.subr.msk.bf16.mxu1 %vm896_vm2, %v2923_v42 }
 0x1fc   :  { %1702 = vmatpush1.bf16.msra.mxu1 %v1668_v48 }
 0x1fd   :  { %1948 = vmatprep.subr.bf16.mxu1 %v3478_v50 }
 0x1ff   :  { %1706 = vmatmul.mubr.bf16.vlgmr.msra.gmra.mrb[0].mxu1 %v4146_v49  ;;  %v3487_v49 = vld [vmem:[%s4727_s3 + $0x3d4] ss:$8 sps:$4 sm:$0xff]  }
 0x200   :  { %2926 = vmatprep.mubr.msk.bf16.mxu1 %vm883_vm4, %v4185_v11  ;;  %1949 = vmatpush1.bf16.msra.mxu1 %v3476_v47  ;;  %v4381_v11 = vmax.f32 %v4065_v4, %v3211_v3  ;;  %v589_v4 = vsel %vm578_vm3, %v3210_v55, %v3211_v3  ;;  %v3522_v55 = vld [vmem:[%s4729_s5 + $0x58] sm:$0xff]  }
 0x201   :  { %1950 = vmatprep.subr.bf16.mxu1 %v3481_v51  ;;  %v635_v60 = vmax.f32 %v4063_v2, %v589_v4  ;;  %v3496_v2 = vld [vmem:[%s4727_s3 + $0x404] ss:$8 sps:$4 sm:$0xff]   ;;  %v3525_v4 = vld [vmem:[%s4729_s5 + $0x70] sm:$0xff]  }
 0x202   :  { %v660_v58 = vmax.f32 %v4381_v11, 0.0  ;;  %v3521_v11 = vld [vmem:[%s4729_s5 + $0x50] sm:$0xff]  }
 0x203   :  { %v659_v0 = vmax.f32 %v635_v60, 0.0 }
 0x204   :  { %1951 = vmatpush1.bf16.msra.mxu1 %v3479_v54  ;;  %v1488_v62 = vpack.c.bf16 %v660_v58, %v658_v5  ;;  %v3502_v5 = vld [vmem:[%s4727_s3 + $0x424] ss:$8 sps:$4 sm:$0xff]  }
 0x205   :  { %1952 = vmatprep.subr.bf16.mxu1 %v3484_v27 }
 0x207   :  { %1716 = vmatmul.mubr.bf16.gmra.mrb[4].mxu1 %v4190_v13  ;;  %v3488_v13 = vld [vmem:[%s4727_s3 + $0x3e0] ss:$8 sps:$4 sm:$0xff]  }
 0x208   :  { %2927 = vmatprep.mubr.msk.bf16.mxu1 %vm883_vm4, %v4231_v45  ;;  %1953 = vmatpush1.bf16.msra.mxu1 %v3482_v37  ;;  %v3493_v45 = vld [vmem:[%s4727_s3 + $0x3f4] ss:$8 sps:$4 sm:$0xff]   ;;  %v3561_v37 = vmov 0  }
 0x209   :  { %1954 = vmatprep.subr.bf16.mxu1 %v3487_v49  ;;  %2226 = vmatprep.subr.bf16.mxu0 %v3561_v37  ;;  %v3520_v49 = vld [vmem:[%s4729_s5 + $0x48] sm:$0xff]  }
 0x20a   :  { %2227 = vmatpush1.bf16.msra.mxu0 %v3520_v49 }
 0x20b   :  { %2228 = vmatprep.subr.bf16.mxu0 %v3561_v37 }
 0x20c   :  { %1955 = vmatpush1.bf16.msra.mxu1 %v3485_v1  ;;  %v3523_v1 = vld [vmem:[%s4729_s5 + $0x60] sm:$0xff]  }
 0x20d   :  { %1956 = vmatprep.subr.bf16.mxu1 %v3490_v56  ;;  %v3524_v56 = vld [vmem:[%s4729_s5 + $0x68] sm:$0xff]  }
 0x20e   :  { %2229 = vmatpush1.bf16.msra.mxu0 %v3521_v11 }
 0x20f   :  { %1726 = vmatmul.mubr.bf16.gmra.mrb[8].mxu1 %v4234_v38  ;;  %v1487_v38 = vpack.c.bf16 %v659_v0, %v4295_v12  ;;  %v3509_v12 = vld [vmem:[%s4727_s3 + $0x450] ss:$8 sps:$4 sm:$0xff]   ;;  %2230 = vmatprep.subr.bf16.mxu0 %v3561_v37 }
 0x210   :  { %2928 = vmatprep.mubr.msk.bf16.mxu1 %vm883_vm4, %v1488_v62  ;;  %1957 = vmatpush1.bf16.msra.mxu1 %v3488_v13 }
 0x211   :  { %1958 = vmatprep.subr.bf16.mxu1 %v3493_v45 }
 0x212   :  { %2231 = vmatpush1.bf16.msra.mxu0 %v3522_v55 }
 0x213   :  { %2232 = vmatprep.subr.bf16.mxu0 %v3561_v37 }
 0x214   :  { %1959 = vmatpush1.bf16.msra.mxu1 %v3491_v30 }
 0x215   :  { %1960 = vmatprep.subr.bf16.mxu1 %v3496_v2 }
 0x216   :  { %2233 = vmatpush1.bf16.msra.mxu0 %v3523_v1 }
 0x217   :  { %1736 = vmatmul.mubr.bf16.gmra.mrb[12].mxu1 %v1487_v38  ;;  %2234 = vmatprep.subr.bf16.mxu0 %v3561_v37 }
 0x218   :  { %1961 = vmatpush1.bf16.msra.mxu1 %v3494_v63  ;;  %2989 = vmatprep.mubr.msk.bf16.mxu1 %vm883_vm4, %v4163_v59  ;;  %v3503_v59 = vld [vmem:[%s4727_s3 + $0x430] ss:$8 sps:$4 sm:$0xff]  }
 0x219   :  { %1962 = vmatprep.subr.bf16.mxu1 %v3499_v57  ;;  %v3526_v63 = vld [vmem:[%s4729_s5 + $0x78] sm:$0xff]  }
 0x21a   :  { %2235 = vmatpush1.bf16.msra.mxu0 %v3524_v56 }
 0x21b   :  { %2236 = vmatprep.subr.bf16.mxu0 %v3561_v37 }
 0x21c   :  { %1963 = vmatpush1.bf16.msra.mxu1 %v3497_v18 }
 0x21d   :  { %1964 = vmatprep.subr.bf16.mxu1 %v3502_v5 }
 0x21e   :  { %2237 = vmatpush1.bf16.msra.mxu0 %v3525_v4 }
 0x21f   :  { %2238 = vmatprep.subr.bf16.mxu0 %v3561_v37 }
 0x220   :  { %1965 = vmatpush1.bf16.msra.mxu1 %v3500_v53 }
 0x221   :  { %1966 = vmatprep.subr.bf16.mxu1 %v3505_v8 }
 0x222   :  { %2239 = vmatpush1.bf16.msra.mxu0 %v3526_v63 }
 0x223   :  { %2240 = vmatprep.subr.bf16.mxu0 %v3561_v37 }
 0x224   :  { %1967 = vmatpush1.bf16.msra.mxu1 %v3503_v59 }
 0x225   :  { %1968 = vmatprep.subr.bf16.mxu1 %v3508_v17 }
 0x228   :  { %1969 = vmatpush1.bf16.msra.mxu1 %v3506_v9 }
 0x229   :  { %1970 = vmatprep.subr.bf16.mxu1 %v3511_v7 }
 0x22c   :  { %1971 = vmatpush1.bf16.msra.mxu1 %v3509_v12  ;;  %v3528_v12 = vld [vmem:[%s4729_s5 + $0x88] sm:$0x3f]  }
 0x22d   :  { %1972 = vmatprep.subr.bf16.mxu1 %v3514_v52 }
 0x230   :  { %1973 = vmatpush1.bf16.msra.mxu1 %v3512_v14 }
 0x231   :  { %1974 = vmatprep.subr.bf16.mxu1 %v3517_v25 }
 0x234   :  { %1975 = vmatpush1.bf16.msra.mxu1 %v3515_v26 }
 0x235   :  { %2988 = vmatprep.subr.msk.bf16.mxu1 %vm896_vm2, %v2987_v34  ;;  %v2224_v34 = vsel %vm322_vm1, %v3528_v12, 0  ;;  %v3531_v12 = vld [vmem:[%s4729_s5 + $0x10] sm:$0xff]  }
 0x238   :  { %1977 = vmatpush1.bf16.msra.mxu1 %v1943_v43 }
 0x23b   :  { %1981 = vmatmul.mubr.bf16.vlgmr.msra.gmra.mrb[0].mxu1 %v4168_v61  ;;  %v1763_v61 = vpack.c.bf16 %v662_v33, %v660_v58  ;;  %v2037_v58 = vld [vmem:[%s4730_s4] sm:$0x3] }
 0x23c   :  { %2990 = vmatprep.mubr.msk.bf16.mxu1 %vm883_vm4, %v4207_v32  ;;  %v661_v32 = vmax.f32 %v637_v40, 0.0  ;;  %v4526_v60 = vrot.slane %v2037_v58, %v81_v22 }
 0x23e   :  { %v1762_v23 = vpack.c.bf16 %v661_v32, %v659_v0  ;;  %v4531_v0 = vrot.slane %v2037_v58, %v85_v24  ;;  %v3527_v24 = vld [vmem:[%s4729_s5 + $0x80] sm:$0xff]  }
 0x23f   :  { %2241 = vmatpush1.bf16.msra.mxu0 %v3527_v24 }
 0x240   :  { %2242 = vmatprep.subr.bf16.mxu0 %v3561_v37 }
 0x243   :  { %1991 = vmatmul.mubr.bf16.gmra.mrb[4].mxu1 %v4212_v36  ;;  %2243 = vmatpush1.bf16.msra.mxu0 %v2224_v34  ;;  %v3535_v34 = vld [vmem:[%s4729_s5 + $0x30] sm:$0xff]  }
 0x244   :  { %2991 = vmatprep.mubr.msk.bf16.mxu1 %vm883_vm4, %v4287_v10  ;;  %2325 = vmatprep.subr.bf16.mxu0 %v3561_v37 }
 0x24b   :  { %2001 = vmatmul.mubr.bf16.gmra.mrb[8].mxu1 %v4304_v15 }
 0x24c   :  { %2992 = vmatprep.mubr.msk.bf16.mxu1 %vm883_vm4, %v1763_v61 }
 0x253   :  { %2011 = vmatmul.mubr.bf16.gmra.mrb[12].mxu1 %v1762_v23 }
 0x262   :  { %v937_v41 = vpop.f32.mrb[48].mxu0 }
 0x263   :  { %v939_v36 = vpop.f32.mrb[49].mxu0 }
 0x264   :  { %v941_v19 = vpop.f32.mrb[50].mxu0 }
 0x265   :  { %v943_v42 = vpop.f32.mrb[51].mxu0 }
 0x272   :  { %v947_v10 = vpop.f32.mrb[52].mxu0 }
 0x273   :  { %v949_v46 = vpop.f32.mrb[53].mxu0 }
 0x274   :  { %v951_v48 = vpop.f32.mrb[54].mxu0 }
 0x275   :  { %v4479_v50 = vpop.f32.mrb[55].mxu0 }
 0x282   :  { %v4481_v16 = vpop.f32.mrb[56].mxu0 }
 0x283   :  { %v4483_v47 = vpop.f32.mrb[57].mxu0 }
 0x284   :  { %v4485_v51 = vpop.f32.mrb[58].mxu0 }
 0x285   :  { %v4487_v15 = vpop.f32.mrb[59].mxu0 }
 0x292   :  { %v4489_v44 = vpop.f32.mrb[60].mxu0 }
 0x293   :  { %v4491_v54 = vpop.f32.mrb[61].mxu0 }
 0x294   :  { %v4493_v27 = vpop.f32.mrb[62].mxu0 }
 0x295   :  { %v4495_v3 = vpop.f32.mrb[63].mxu0 }
 0x30e   :  { %v1982_v13 = vpop.f32.mrb[0].mxu1 }
 0x30f   :  { %v3090_v45 = vadd.f32 %v1982_v13, %v937_v41  ;;  %v1984_v62 = vpop.f32.mrb[1].mxu1 }
 0x310   :  { %v3091_v30 = vadd.f32 %v1984_v62, %v939_v36  ;;  %v1986_v2 = vpop.f32.mrb[2].mxu1 }
 0x311   :  { %v3092_v38 = vadd.f32 %v1986_v2, %v941_v19  ;;  %v1988_v57 = vpop.f32.mrb[3].mxu1  ;;  %v2049_v22 = vadd.f32 %v3090_v45, %v4526_v60 }
 0x312   :  { %v3093_v18 = vadd.f32 %v1988_v57, %v943_v42  ;;  %v2050_v53 = vadd.f32 %v3091_v30, %v4531_v0 }
 0x313   :  { %v2051_v5 = vadd.f32 %v3092_v38, %v4526_v60 }
 0x314   :  { %v2052_v20 = vadd.f32 %v3093_v18, %v4531_v0 }
 0x315   :  { %v4544_v8 = vmax.f32 %v2049_v22, %v2051_v5 }
 0x316   :  { %v2066_v59 = vmax.f32 %v2050_v53, %v2052_v20  ;;  %v1992_v17 = vpop.f32.mrb[4].mxu1 }
 0x317   :  { %v3094_v9 = vadd.f32 %v1992_v17, %v947_v10  ;;  %v1994_v7 = vpop.f32.mrb[5].mxu1  ;;  %v3529_v17 = vld [vmem:[%s4729_s5] sm:$0xff]  }
 0x318   :  { %v3095_v52 = vadd.f32 %v1994_v7, %v949_v46  ;;  %v1996_v14 = vpop.f32.mrb[6].mxu1  ;;  %v3222_v25 = vpack.i.bf16 %v2066_v59, %v4544_v8 }
 0x319   :  { %v3096_v6 = vadd.f32 %v1996_v14, %v951_v48  ;;  %v1998_v26 = vpop.f32.mrb[7].mxu1  ;;  %v2053_v43 = vadd.f32 %v3094_v9, %v4526_v60  ;;  %v3533_v14 = vld [vmem:[%s4729_s5 + $0x20] sm:$0xff]  }
 0x31a   :  { %v3097_v29 = vadd.f32 %v1998_v26, %v4479_v50  ;;  %3223 = vrot.lane.b32.xlu1 %v3222_v25, %s3562_s30  ;;  %v2054_v28 = vadd.f32 %v3095_v52, %v4531_v0  ;;  %v3532_v52 = vld [vmem:[%s4729_s5 + $0x18] sm:$0xff]   ;;  %v3534_v25 = vld [vmem:[%s4729_s5 + $0x28] sm:$0xff]  }
 0x31b   :  { %v2055_v31 = vadd.f32 %v3096_v6, %v4526_v60 }
 0x31c   :  { %v2056_v35 = vadd.f32 %v3097_v29, %v4531_v0 }
 0x31d   :  { %v2067_v21 = vmax.f32 %v2053_v43, %v2055_v31  ;;  %v3536_v31 = vld [vmem:[%s4729_s5 + $0x38] sm:$0xff]  }
 0x31e   :  { %v2068_v33 = vmax.f32 %v2054_v28, %v2056_v35  ;;  %v2002_v39 = vpop.f32.mrb[8].mxu1  ;;  %v3537_v35 = vld [vmem:[%s4729_s5 + $0x40] sm:$0x3f]  }
 0x31f   :  { %v3098_v40 = vadd.f32 %v2002_v39, %v4481_v16  ;;  %v2004_v61 = vpop.f32.mrb[9].mxu1  ;;  %v2323_v39 = vsel %vm322_vm1, %v3537_v35, 0  ;;  %v3088_v35 = vld [vmem:[%s4733_s7] ss:$0 sm:$0xff] }
 0x320   :  { %v3099_v32 = vadd.f32 %v2004_v61, %v4483_v47  ;;  %v2006_v23 = vpop.f32.mrb[10].mxu1  ;;  %v3217_v41 = vpack.i.bf16 %v2068_v33, %v2067_v21 }
 0x321   :  { %v3100_v36 = vadd.f32 %v2006_v23, %v4485_v51  ;;  %v2008_v19 = vpop.f32.mrb[11].mxu1  ;;  %v2057_v10 = vadd.f32 %v3098_v40, %v4526_v60  ;;  %v3539_v23 = vld [vmem:[%s4729_s5 + $0x98] sm:$0xff]  }
 0x322   :  { %v3101_v42 = vadd.f32 %v2008_v19, %v4487_v15  ;;  %3218 = vrot.lane.b32.xlu0 %v3217_v41, %s3562_s30  ;;  %v2058_v48 = vadd.f32 %v3099_v32, %v4531_v0  ;;  %v3540_v41 = vld [vmem:[%s4729_s5 + $0xa0] sm:$0xff]   ;;  %v3542_v19 = vld [vmem:[%s4729_s5 + $0xb0] sm:$0xff]  }
 0x323   :  { %v2059_v46 = vadd.f32 %v3100_v36, %v4526_v60  ;;  %v3541_v36 = vld [vmem:[%s4729_s5 + $0xa8] sm:$0xff]  }
 0x324   :  { %v2060_v50 = vadd.f32 %v3101_v42, %v4531_v0  ;;  %v3543_v42 = vld [vmem:[%s4729_s5 + $0xb8] sm:$0xff]  }
 0x325   :  { %v4568_v16 = vmax.f32 %v2057_v10, %v2059_v46 }
 0x326   :  { %v4570_v47 = vmax.f32 %v2058_v48, %v2060_v50  ;;  %v2012_v49 = vpop.f32.mrb[12].mxu1  ;;  %v3544_v48 = vld [vmem:[%s4729_s5 + $0xc0] sm:$0xff]  }
 0x327   :  { %v3102_v51 = vadd.f32 %v2012_v49, %v4489_v44  ;;  %v2014_v11 = vpop.f32.mrb[13].mxu1  ;;  %v3545_v49 = vld [vmem:[%s4729_s5 + $0xc8] sm:$0xff]  }
 0x328   :  { %v3103_v15 = vadd.f32 %v2014_v11, %v4491_v54  ;;  %v2016_v55 = vpop.f32.mrb[14].mxu1  ;;  %v3227_v1 = vpack.i.bf16 %v4570_v47, %v4568_v16  ;;  %v3546_v11 = vld [vmem:[%s4729_s5 + $0xd0] sm:$0x3f]  }
 0x329   :  { %v3104_v56 = vadd.f32 %v2016_v55, %v4493_v27  ;;  %v2018_v58 = vpop.f32.mrb[15].mxu1  ;;  %v2061_v13 = vadd.f32 %v3102_v51, %v4526_v60 }
 0x32a   :  { %v3105_v4 = vadd.f32 %v2018_v58, %v4495_v3  ;;  %3228 = vrot.lane.b32.xlu0 %v3227_v1, %s3562_s30  ;;  %v2062_v44 = vadd.f32 %v3103_v15, %v4531_v0  ;;  %v2443_v1 = vsel %vm322_vm1, %v3546_v11, 0 }
 0x32b   :  { %v2063_v45 = vadd.f32 %v3104_v56, %v4526_v60 }
 0x32c   :  { %v2064_v62 = vadd.f32 %v3105_v4, %v4531_v0 }
 0x32d   :  { %v4583_v54 = vmax.f32 %v2061_v13, %v2063_v45  ;;  %v3548_v13 = vld [vmem:[%s4729_s5 + $0xe0] sm:$0xff]   ;;  %v3549_v45 = vld [vmem:[%s4729_s5 + $0xe8] sm:$0xff]  }
 0x32e   :  { %v4585_v30 = vmax.f32 %v2062_v44, %v2064_v62  ;;  %v3550_v44 = vld [vmem:[%s4729_s5 + $0xf0] sm:$0xff]   ;;  %v3551_v62 = vld [vmem:[%s4729_s5 + $0xf8] sm:$0xff]  }
 0x330   :  { %v3232_v27 = vpack.i.bf16 %v4585_v30, %v4583_v54 }
 0x332   :  { %3233 = vrot.lane.b32.xlu1 %v3232_v27, %s3562_s30 }
 0x38c   :  { %v3224_v3 = vpop.permute.xlu1 %3223 }
 0x38d   :  { %v3226_v2 = vunpack.i.h.bf16 %v3224_v3  ;;  %v3225_v6 = vunpack.i.l.bf16 %v3224_v3  ;;  %v3553_v3 = vld [vmem:[%s4729_s5 + $0x108] sm:$0xff]  }
 0x38f   :  { %v2111_v38 = vmax.f32 %v2066_v59, %v3226_v2  ;;  %v3530_v59 = vld [vmem:[%s4729_s5 + $0x8] sm:$0xff]   ;;  %v2098_v29 = vsel %vm2097_vm5, %v3225_v6, %v3226_v2 }
 0x390   :  { %v2110_v28 = vmax.f32 %v4544_v8, %v2098_v29  ;;  %v3538_v8 = vld [vmem:[%s4729_s5 + $0x90] sm:$0xff]  }
 0x391   :  { %v2119_v5 = vmax.f32 %v2111_v38, 0.0 }
 0x393   :  { %v2127_v7 = vpack.c.bf16 %v2119_v5, %v2119_v5 }
 0x394   :  { %v3219_v63 = vpop.permute.xlu0 %3218 }
 0x395   :  { %v3221_v57 = vunpack.i.h.bf16 %v3219_v63  ;;  %v3220_v18 = vunpack.i.l.bf16 %v3219_v63  ;;  %v3554_v63 = vld [vmem:[%s4729_s5 + $0x110] sm:$0xff]  }
 0x397   :  { %v2113_v60 = vmax.f32 %v2068_v33, %v3221_v57  ;;  %v2099_v22 = vsel %vm2097_vm5, %v3220_v18, %v3221_v57  ;;  %v2118_v33 = vmax.f32 %v2110_v28, 0.0  ;;  %v3555_v57 = vld [vmem:[%s4729_s5 + $0x118] sm:$0x3f]  }
 0x398   :  { %v2112_v0 = vmax.f32 %v2067_v21, %v2099_v22 }
 0x399   :  { %v2121_v53 = vmax.f32 %v2113_v60, 0.0  ;;  %v2126_v61 = vpack.c.bf16 %v2118_v33, %v2118_v33  ;;  %v2564_v60 = vsel %vm322_vm1, %v3555_v57, 0 }
 0x39a   :  { %v2120_v20 = vmax.f32 %v2112_v0, 0.0  ;;  %v14_v0 = vstv %s4731_s8 }
 0x39b   :  { %v2147_v24 = vpack.c.bf16 %v2121_v53, %v2121_v53  ;;  %15 = vst [vmem:[#allocation2] sm:$0x1] %v14_v0 }
 0x39c   :  { %v2146_v9 = vpack.c.bf16 %v2120_v20, %v2120_v20  ;;  %v3229_v26 = vpop.permute.xlu0 %3228 }
 0x39d   :  { %3020 = vmatprep.mubr.msk.bf16.mxu0 %vm285_vm0, %v2147_v24  ;;  %v3231_v43 = vunpack.i.h.bf16 %v3229_v26  ;;  %v3230_v10 = vunpack.i.l.bf16 %v3229_v26  ;;  %v3087_v26 = vld [vmem:[%s4732_s6] ss:$0 sm:$0xff] }
 0x39e   :  { %2259 = vmatmul.mubr.bf16.vlgmr.msra.gmra.mrb[64].mxu0 %v2146_v9 }
 0x39f   :  { %2326 = vmatpush1.bf16.msra.mxu0 %v3529_v17  ;;  %3030 = vmatprep.mubr.msk.bf16.mxu0 %vm285_vm0, %v2127_v7  ;;  %v2115_v21 = vmax.f32 %v4570_v47, %v3231_v43  ;;  %v2100_v50 = vsel %vm2097_vm5, %v3230_v10, %v3231_v43 }
 0x3a0   :  { %2327 = vmatprep.subr.bf16.mxu0 %v3561_v37  ;;  %v2114_v51 = vmax.f32 %v4568_v16, %v2100_v50  ;;  %v3547_v16 = vld [vmem:[%s4729_s5 + $0xd8] sm:$0xff]  }
 0x3a1   :  { %v2123_v40 = vmax.f32 %v2115_v21, 0.0 }
 0x3a2   :  { %v2122_v55 = vmax.f32 %v2114_v51, 0.0 }
 0x3a3   :  { %2328 = vmatpush1.bf16.msra.mxu0 %v3530_v59  ;;  %v2366_v32 = vpack.c.bf16 %v2123_v40, %v2123_v40  ;;  %v3089_v40 = vld [vmem:[#allocation2] ss:$0 sm:$0xff] }
 0x3a4   :  { %2329 = vmatprep.subr.bf16.mxu0 %v3561_v37  ;;  %v3234_v46 = vpop.permute.xlu1 %3233  ;;  %v2365_v58 = vpack.c.bf16 %v2122_v55, %v2122_v55 }
 0x3a5   :  { %v3236_v47 = vunpack.i.h.bf16 %v3234_v46  ;;  %v3235_v27 = vunpack.i.l.bf16 %v3234_v46 }
 0x3a7   :  { %2330 = vmatpush1.bf16.msra.mxu0 %v3531_v12  ;;  %v2117_v15 = vmax.f32 %v4585_v30, %v3236_v47  ;;  %v3552_v30 = vld [vmem:[%s4729_s5 + $0x100] sm:$0xff]   ;;  %v2101_v2 = vsel %vm2097_vm5, %v3235_v27, %v3236_v47 }
 0x3a8   :  { %2331 = vmatprep.subr.bf16.mxu0 %v3561_v37  ;;  %v2116_v38 = vmax.f32 %v4583_v54, %v2101_v2 }
 0x3a9   :  { %v2125_v56 = vmax.f32 %v2117_v15, 0.0 }
 0x3aa   :  { %v2124_v18 = vmax.f32 %v2116_v38, 0.0 }
 0x3ab   :  { %2332 = vmatpush1.bf16.msra.mxu0 %v3532_v52  ;;  %v2487_v4 = vpack.c.bf16 %v2125_v56, %v2125_v56 }
 0x3ac   :  { %2333 = vmatprep.subr.bf16.mxu0 %v3561_v37  ;;  %v2486_v22 = vpack.c.bf16 %v2124_v18, %v2124_v18 }
 0x3af   :  { %2334 = vmatpush1.bf16.msra.mxu0 %v3533_v14 }
 0x3b0   :  { %2335 = vmatprep.subr.bf16.mxu0 %v3561_v37 }
 0x3b3   :  { %2336 = vmatpush1.bf16.msra.mxu0 %v3534_v25 }
 0x3b4   :  { %2337 = vmatprep.subr.bf16.mxu0 %v3561_v37 }
 0x3b7   :  { %2338 = vmatpush1.bf16.msra.mxu0 %v3535_v34 }
 0x3b8   :  { %2339 = vmatprep.subr.bf16.mxu0 %v3561_v37 }
 0x3bb   :  { %2340 = vmatpush1.bf16.msra.mxu0 %v3536_v31 }
 0x3bc   :  { %2341 = vmatprep.subr.bf16.mxu0 %v3561_v37 }
 0x3bf   :  { %2342 = vmatpush1.bf16.msra.mxu0 %v2323_v39 }
 0x3c0   :  { %2445 = vmatprep.subr.bf16.mxu0 %v3561_v37 }
 0x3c2   :  { %2358 = vmatmul.mubr.bf16.vlgmr.msra.gmra.mrb[68].mxu0 %v2126_v61 }
 0x3c3   :  { %2446 = vmatpush1.bf16.msra.mxu0 %v3538_v8  ;;  %3058 = vmatprep.mubr.msk.bf16.mxu0 %vm285_vm0, %v2366_v32 }
 0x3c4   :  { %2447 = vmatprep.subr.bf16.mxu0 %v3561_v37 }
 0x3c7   :  { %2448 = vmatpush1.bf16.msra.mxu0 %v3539_v23 }
 0x3c8   :  { %2449 = vmatprep.subr.bf16.mxu0 %v3561_v37 }
 0x3cb   :  { %2450 = vmatpush1.bf16.msra.mxu0 %v3540_v41 }
 0x3cc   :  { %2451 = vmatprep.subr.bf16.mxu0 %v3561_v37 }
 0x3cf   :  { %2452 = vmatpush1.bf16.msra.mxu0 %v3541_v36 }
 0x3d0   :  { %2453 = vmatprep.subr.bf16.mxu0 %v3561_v37 }
 0x3d3   :  { %2454 = vmatpush1.bf16.msra.mxu0 %v3542_v19 }
 0x3d4   :  { %2455 = vmatprep.subr.bf16.mxu0 %v3561_v37 }
 0x3d7   :  { %2456 = vmatpush1.bf16.msra.mxu0 %v3543_v42 }
 0x3d8   :  { %2457 = vmatprep.subr.bf16.mxu0 %v3561_v37 }
 0x3db   :  { %2458 = vmatpush1.bf16.msra.mxu0 %v3544_v48 }
 0x3dc   :  { %2459 = vmatprep.subr.bf16.mxu0 %v3561_v37 }
 0x3df   :  { %2460 = vmatpush1.bf16.msra.mxu0 %v3545_v49 }
 0x3e0   :  { %2461 = vmatprep.subr.bf16.mxu0 %v3561_v37 }
 0x3e3   :  { %2462 = vmatpush1.bf16.msra.mxu0 %v2443_v1 }
 0x3e4   :  { %2566 = vmatprep.subr.bf16.mxu0 %v3561_v37 }
 0x3e6   :  { %2478 = vmatmul.mubr.bf16.vlgmr.msra.gmra.mrb[72].mxu0 %v2365_v58 }
 0x3e7   :  { %2567 = vmatpush1.bf16.msra.mxu0 %v3547_v16  ;;  %3086 = vmatprep.mubr.msk.bf16.mxu0 %vm285_vm0, %v2487_v4 }
 0x3e8   :  { %2568 = vmatprep.subr.bf16.mxu0 %v3561_v37 }
 0x3eb   :  { %2569 = vmatpush1.bf16.msra.mxu0 %v3548_v13 }
 0x3ec   :  { %2570 = vmatprep.subr.bf16.mxu0 %v3561_v37 }
 0x3ef   :  { %2571 = vmatpush1.bf16.msra.mxu0 %v3549_v45 }
 0x3f0   :  { %2572 = vmatprep.subr.bf16.mxu0 %v3561_v37 }
 0x3f3   :  { %2573 = vmatpush1.bf16.msra.mxu0 %v3550_v44 }
 0x3f4   :  { %2574 = vmatprep.subr.bf16.mxu0 %v3561_v37 }
 0x3f7   :  { %2575 = vmatpush1.bf16.msra.mxu0 %v3551_v62 }
 0x3f8   :  { %2576 = vmatprep.subr.bf16.mxu0 %v3561_v37 }
 0x3fb   :  { %2577 = vmatpush1.bf16.msra.mxu0 %v3552_v30 }
 0x3fc   :  { %2578 = vmatprep.subr.bf16.mxu0 %v3561_v37 }
 0x3ff   :  { %2579 = vmatpush1.bf16.msra.mxu0 %v3553_v3 }
 0x400   :  { %2580 = vmatprep.subr.bf16.mxu0 %v3561_v37 }
 0x403   :  { %2581 = vmatpush1.bf16.msra.mxu0 %v3554_v63 }
 0x404   :  { %2582 = vmatprep.subr.bf16.mxu0 %v3561_v37 }
 0x407   :  { %2583 = vmatpush1.bf16.msra.mxu0 %v2564_v60 }
 0x40a   :  { %2599 = vmatmul.mubr.bf16.vlgmr.msra.gmra.mrb[76].mxu0 %v2486_v22 }
 0x471   :  { %v2260_v54 = vpop.f32.mrb[64].mxu0 }
 0x472   :  { %v2262_v5 = vpop.f32.mrb[65].mxu0 }
 0x473   :  { %v2263_v53 = vpop.f32.mrb[66].mxu0 }
 0x474   :  { %v2264_v20 = vpop.f32.mrb[67].mxu0 }
 0x495   :  { %v2359_v24 = vpop.f32.mrb[68].mxu0 }
 0x496   :  { %v2360_v17 = vadd.f32 %v2359_v24, %v2260_v54  ;;  %v2361_v9 = vpop.f32.mrb[69].mxu0 }
 0x497   :  { %v2362_v7 = vpop.f32.mrb[70].mxu0 }
 0x498   :  { %v2363_v59 = vpop.f32.mrb[71].mxu0 }
 0x4b9   :  { %v2479_v37 = vpop.f32.mrb[72].mxu0 }
 0x4ba   :  { %v2485_v12 = vadd.f32 %v2479_v37, %v2360_v17  ;;  %v2481_v52 = vpop.f32.mrb[73].mxu0 }
 0x4bb   :  { %v2482_v14 = vpop.f32.mrb[74].mxu0 }
 0x4bc   :  { %v2483_v25 = vpop.f32.mrb[75].mxu0 }
 0x4dd   :  { %v2600_v6 = vpop.f32.mrb[76].mxu0 }
 0x4de   :  { %v2606_v34 = vadd.f32 %v2600_v6, %v2485_v12  ;;  %v2602_v29 = vpop.f32.mrb[77].mxu0 }
 0x4df   :  { %v2603_v43 = vpop.f32.mrb[78].mxu0 }
 0x4e0   :  { %v2614_v31 = vadd.f32 %v3087_v26, %v2606_v34  ;;  %v2604_v28 = vpop.f32.mrb[79].mxu0 }
 0x4e2   :  { %v2615_v21 = vmax.f32 %v2614_v31, 0.0 }
 0x4e4   :  { %v2623_v33 = vmul.f32 %v3088_v35, %v2615_v21 }
 0x4e6   :  { %v2625_v39 = vsel %vm2624_vm6, %v2623_v33, 0.0 }
 0x4e7   :  { %2626 = vadd.xlane.f32.xlu0 %v2625_v39 }
 0x574   :  { %v2627_v8 = vpop.xlane.xlu0 %2626 }
 0x575   :  { %v2635_v61 = vadd.f32 %v3089_v40, %v2627_v8 }
 0x577   :  { %v2636_v32 = vsub.f32 0.0, %v2635_v61 }
 0x579   :  { %v2637_v23 = vmul.f32 1.442695, %v2636_v32 }
 0x57b   :  { %3556 = vpow2.f32 %v2637_v23 }
 0x585   :  { %v3557_v41 = vpop.eup %3556 }
 0x586   :  { %v2639_v36 = vadd.f32 1.0, %v3557_v41 }
 0x588   :  { %3558 = vrcp.f32 %v2639_v36 }
 0x592   :  { %v3559_v19 = vpop.eup %3558 }
 0x593   :  { %2642 = vst.msk [vmem:[%s4734_s9] sm:$0xff] %vm2641_vm7, %v3559_v19 }

</bundles_post_ra>
